<compile_context>
chip_gen: v6e
topology: v6e:2x2x1
jax: 0.10.0
libtpu: 0.0.40
codegen_flags: <defaults>
</compile_context>

<pallas_src>
import math
from functools import partial

import jax
import jax.numpy as jnp
from jax.experimental import pallas as pl
from jax.experimental.pallas import tpu as pltpu

FREQ_EMB = 256   # frequency_embedding_size in TimeEmbedding
HALF = FREQ_EMB // 2
D_PAD = 128      # lane-dense padded feature width


# ----------------------------------------------------------------------------
# Fused Pallas kernel (per-row t): timestep embedding + full SimpleNet stack
# ----------------------------------------------------------------------------
def _simplenet_kernel(x_ref, t_ref, freqs_ref, w1c_ref, w1s_ref, b1_ref,
                      wfc_ref, bfc_ref, w2_ref, b2_ref, o_ref,
                      *, n_layers, d_pad):
    # Sinusoidal timestep embedding computed in-kernel (EUP transcendentals).
    t = t_ref[...]                                    # (tb, 1)
    freqs = freqs_ref[...]                            # (1, 128)
    args = t * freqs                                  # (tb, 128)
    emb_cos = jnp.cos(args)
    emb_sin = jnp.sin(args)

    # All layers' time-MLP first Linear in one wide matmul (cos/sin halves of
    # the stacked weight), then SiLU.
    a_all = (jnp.dot(emb_cos, w1c_ref[...], preferred_element_type=jnp.float32)
             + jnp.dot(emb_sin, w1s_ref[...], preferred_element_type=jnp.float32)
             + b1_ref[...])                           # (tb, L*d_pad)
    a_all = a_all * jax.nn.sigmoid(a_all)             # SiLU

    h = x_ref[...]                                    # (tb, d_pad)
    for i in range(n_layers):                         # static unroll
        # TimeLinear.fc
        h = jnp.dot(h, wfc_ref[i],
                    preferred_element_type=jnp.float32) + bfc_ref[i]
        # TimeEmbedding.mlp second Linear (per-layer), 128-lane-aligned slice
        a_i = a_all[:, i * d_pad:(i + 1) * d_pad]
        alpha = jnp.dot(a_i, w2_ref[i],
                        preferred_element_type=jnp.float32) + b2_ref[i]
        h = alpha * h
        if i < n_layers - 1:
            h = jnp.maximum(h, 0.0)                   # ReLU between layers

    o_ref[...] = h.astype(o_ref.dtype)


# ----------------------------------------------------------------------------
# Fast-path kernel (shared / scalar t): alpha precomputed in the wrapper
# ----------------------------------------------------------------------------
def _simplenet_alpha_kernel(x_ref, alpha_ref, wfc_ref, bfc_ref, o_ref,
                            *, n_layers):
    h = x_ref[...]                                    # (tb, d_pad)
    for i in range(n_layers):
        h = jnp.dot(h, wfc_ref[i],
                    preferred_element_type=jnp.float32) + bfc_ref[i]
        h = alpha_ref[i] * h                          # (1,d_pad) broadcast
        if i < n_layers - 1:
            h = jnp.maximum(h, 0.0)
    o_ref[...] = h.astype(o_ref.dtype)


# ----------------------------------------------------------------------------
# Wrapper glue: sinusoidal embedding (for the JAX reference) + init + packing
# ----------------------------------------------------------------------------
def timestep_embedding(t, dim=FREQ_EMB, max_period=10000.0):
    t = jnp.atleast_1d(t)
    half = dim // 2
    freqs = jnp.exp(
        -math.log(max_period) * jnp.arange(half, dtype=jnp.float32) / half)
    args = t[:, None].astype(jnp.float32) * freqs[None, :]
    return jnp.concatenate([jnp.cos(args), jnp.sin(args)], axis=-1)


def init_linear(key, fan_in, fan_out):
    kw, kb = jax.random.split(key)
    bound = 1.0 / math.sqrt(fan_in)
    w = jax.random.uniform(kw, (fan_in, fan_out), jnp.float32, -bound, bound)
    b = jax.random.uniform(kb, (1, fan_out), jnp.float32, -bound, bound)
    return w, b


def init_simplenet(key, dim_in, dim_out, dim_hids):
    layer_dims = [dim_in] + list(dim_hids) + [dim_out]
    params = []
    for in_dim, out_dim in zip(layer_dims[:-1], layer_dims[1:]):
        key, k_fc, k_m1, k_m2 = jax.random.split(key, 4)
        wfc, bfc = init_linear(k_fc, in_dim, out_dim)        # TimeLinear.fc
        w1, b1 = init_linear(k_m1, FREQ_EMB, out_dim)        # TimeEmbedding.mlp[0]
        w2, b2 = init_linear(k_m2, out_dim, out_dim)         # TimeEmbedding.mlp[2]
        params.append((wfc, bfc, w1, b1, w2, b2))
    return params


def pack_params(params, d_pad=D_PAD):
    """Pack original params into lane-dense (128-padded) stacked arrays. Done ONCE."""
    L = len(params)
    w1c = jnp.zeros((HALF, L * d_pad), jnp.float32)   # cos half of mlp[0] weight
    w1s = jnp.zeros((HALF, L * d_pad), jnp.float32)   # sin half of mlp[0] weight
    b1 = jnp.zeros((1, L * d_pad), jnp.float32)
    wfc = jnp.zeros((L, d_pad, d_pad), jnp.float32)
    bfc = jnp.zeros((L, 1, d_pad), jnp.float32)
    w2 = jnp.zeros((L, d_pad, d_pad), jnp.float32)
    b2 = jnp.zeros((L, 1, d_pad), jnp.float32)
    for i, (wfc_i, bfc_i, w1_i, b1_i, w2_i, b2_i) in enumerate(params):
        d_in, d_out = wfc_i.shape
        assert d_in <= d_pad and d_out <= d_pad, \
            f"layer {i}: dims ({d_in},{d_out}) exceed lane pad {d_pad}"
        w1c = w1c.at[:, i * d_pad:i * d_pad + d_out].set(w1_i[:HALF])
        w1s = w1s.at[:, i * d_pad:i * d_pad + d_out].set(w1_i[HALF:])
        b1 = b1.at[:, i * d_pad:i * d_pad + d_out].set(b1_i)
        wfc = wfc.at[i, :d_in, :d_out].set(wfc_i)
        bfc = bfc.at[i, :, :d_out].set(bfc_i)
        w2 = w2.at[i, :d_out, :d_out].set(w2_i)
        b2 = b2.at[i, :, :d_out].set(b2_i)
    freqs = jnp.exp(
        -math.log(10000.0) * jnp.arange(HALF, dtype=jnp.float32) / HALF
    ).reshape(1, HALF)
    return dict(w1c=w1c, w1s=w1s, b1=b1, wfc=wfc, bfc=bfc, w2=w2, b2=b2,
                freqs=freqs)


def _choose_tile(B):
    """Batch tile: big (HBM-roofline) but always >=2 grid steps once B_pad>=512
    so the "parallel" axis can shard across both v7x TensorCores."""
    B8 = max(8, ((B + 7) // 8) * 8)
    if B8 >= 512:
        tb = min(1024, ((B8 // 2 + 7) // 8) * 8)
    else:
        tb = B8
    B_pad = ((B8 + tb - 1) // tb) * tb
    return tb, B_pad


# ----------------------------------------------------------------------------
# Forward implementations (jitted once per shape in SimpleNetPallas)
# ----------------------------------------------------------------------------
def _forward_per_row_t(packed, x, t, *, n_layers, dim_out, d_pad):
    B, dim_in = x.shape
    tb, B_pad = _choose_tile(B)

    x_pad = jnp.zeros((B_pad, d_pad), jnp.float32).at[:B, :dim_in].set(
        x.astype(jnp.float32))
    t_pad = jnp.zeros((B_pad, 1), jnp.float32).at[:B, 0].set(
        t.astype(jnp.float32))

    kernel = partial(_simplenet_kernel, n_layers=n_layers, d_pad=d_pad)
    out_pad = pl.pallas_call(
        kernel,
        out_shape=jax.ShapeDtypeStruct((B_pad, d_pad), jnp.float32),
        grid=(B_pad // tb,),
        in_specs=[
            pl.BlockSpec((tb, d_pad), lambda b: (b, 0)),          # x (padded)
            pl.BlockSpec((tb, 1), lambda b: (b, 0)),              # t column
            pl.BlockSpec(packed['freqs'].shape, lambda b: (0, 0)),
            pl.BlockSpec(packed['w1c'].shape, lambda b: (0, 0)),
            pl.BlockSpec(packed['w1s'].shape, lambda b: (0, 0)),
            pl.BlockSpec(packed['b1'].shape, lambda b: (0, 0)),
            pl.BlockSpec(packed['wfc'].shape, lambda b: (0, 0, 0)),
            pl.BlockSpec(packed['bfc'].shape, lambda b: (0, 0, 0)),
            pl.BlockSpec(packed['w2'].shape, lambda b: (0, 0, 0)),
            pl.BlockSpec(packed['b2'].shape, lambda b: (0, 0, 0)),
        ],
        out_specs=pl.BlockSpec((tb, d_pad), lambda b: (b, 0)),
        compiler_params=pltpu.CompilerParams(
            dimension_semantics=("parallel",)),
    )(x_pad, t_pad, packed['freqs'], packed['w1c'], packed['w1s'], packed['b1'],
      packed['wfc'], packed['bfc'], packed['w2'], packed['b2'])

    return out_pad[:B, :dim_out]


def _forward_shared_t(packed, x, t, *, n_layers, dim_out, d_pad):
    B, dim_in = x.shape
    tb, B_pad = _choose_tile(B)

    # One shared timestep: compute all per-layer alphas here (tiny, XLA-fused).
    t = t.reshape(1, 1).astype(jnp.float32)
    args = t * packed['freqs']                                    # (1, 128)
    a_all = (jnp.cos(args) @ packed['w1c']
             + jnp.sin(args) @ packed['w1s'] + packed['b1'])      # (1, L*d_pad)
    a_all = a_all * jax.nn.sigmoid(a_all)
    alpha = jnp.stack(
        [a_all[:, i * d_pad:(i + 1) * d_pad] @ packed['w2'][i] + packed['b2'][i]
         for i in range(n_layers)], axis=0)                       # (L, 1, d_pad)

    x_pad = jnp.zeros((B_pad, d_pad), jnp.float32).at[:B, :dim_in].set(
        x.astype(jnp.float32))

    kernel = partial(_simplenet_alpha_kernel, n_layers=n_layers)
    out_pad = pl.pallas_call(
        kernel,
        out_shape=jax.ShapeDtypeStruct((B_pad, d_pad), jnp.float32),
        grid=(B_pad // tb,),
        in_specs=[
            pl.BlockSpec((tb, d_pad), lambda b: (b, 0)),          # x (padded)
            pl.BlockSpec(alpha.shape, lambda b: (0, 0, 0)),       # alphas
            pl.BlockSpec(packed['wfc'].shape, lambda b: (0, 0, 0)),
            pl.BlockSpec(packed['bfc'].shape, lambda b: (0, 0, 0)),
        ],
        out_specs=pl.BlockSpec((tb, d_pad), lambda b: (b, 0)),
        compiler_params=pltpu.CompilerParams(
            dimension_semantics=("parallel",)),
    )(x_pad, alpha, packed['wfc'], packed['bfc'])

    return out_pad[:B, :dim_out]


class SimpleNetPallas:
    """Packs weights once; forward is a single jitted pallas_call."""

    def __init__(self, params, d_pad=D_PAD):
        self.n_layers = len(params)
        self.dim_out = params[-1][0].shape[1]
        self.d_pad = d_pad
        self.packed = pack_params(params, d_pad)      # packed ONCE
        kw = dict(n_layers=self.n_layers, dim_out=self.dim_out, d_pad=d_pad)
        self._fwd_per_row = jax.jit(partial(_forward_per_row_t, **kw))
        self._fwd_shared = jax.jit(partial(_forward_shared_t, **kw))

    def __call__(self, x, t):
        t = jnp.atleast_1d(jnp.asarray(t, jnp.float32))
        if t.shape[0] == 1:                           # shared-timestep fast path
            return self._fwd_shared(self.packed, x, t)
        assert t.shape[0] == x.shape[0], "t must be scalar or have batch length"
        return self._fwd_per_row(self.packed, x, t)


# ----------------------------------------------------------------------------
# Pure-JAX reference for sanity checking
# ----------------------------------------------------------------------------
def simplenet_forward_ref(params, x, t):
    t_freq = timestep_embedding(t, FREQ_EMB)
    n_layers = len(params)
    for i, (wfc, bfc, w1, b1, w2, b2) in enumerate(params):
        h = x @ wfc + bfc
        a = t_freq @ w1 + b1
        a = a * jax.nn.sigmoid(a)
        alpha = a @ w2 + b2
        x = alpha * h
        if i < n_layers - 1:
            x = jnp.maximum(x, 0.0)
    return x


if __name__ == "__main__":
    # 2-D plot diffusion: 2-D points in, 2-D noise out, small hidden MLP.
    B = 8
    dim_in, dim_out = 2, 2
    dim_hids = [32, 32]
    num_timesteps = 1000

    key = jax.random.PRNGKey(0)
    k_params, k_x, k_t = jax.random.split(key, 3)

    params = init_simplenet(k_params, dim_in, dim_out, dim_hids)
    x = jax.random.normal(k_x, (B, dim_in), jnp.float32)
    t = jax.random.randint(k_t, (B,), 0, num_timesteps).astype(jnp.float32)

    net = SimpleNetPallas(params)

    # Per-row-timestep path (training-style)
    out = jax.block_until_ready(net(x, t))
    ref = simplenet_forward_ref(params, x, t)
    assert out.shape == (B, dim_out), out.shape
    assert jnp.allclose(out, ref, atol=1e-3, rtol=1e-3), \
        f"per-row-t max err {jnp.max(jnp.abs(out - ref))}"

    # Shared-timestep fast path (sampling-style)
    t_scalar = jnp.float32(123.0)
    out_s = jax.block_until_ready(net(x, t_scalar))
    ref_s = simplenet_forward_ref(params, x, jnp.atleast_1d(t_scalar))
    assert out_s.shape == (B, dim_out), out_s.shape
    assert jnp.allclose(out_s, ref_s, atol=1e-3, rtol=1e-3), \
        f"shared-t max err {jnp.max(jnp.abs(out_s - ref_s))}"

    print("KERNEL_OK")
</pallas_src>

<mosaic_0001>
module attributes {stable_mosaic.version = 11 : i64} {
  func.func @_simplenet_kernel(%arg0: i32, %arg1: memref<8x128xf32, #tpu.memory_space<vmem>>, %arg2: memref<8x1xf32, #tpu.memory_space<vmem>>, %arg3: memref<1x128xf32, #tpu.memory_space<vmem>>, %arg4: memref<128x384xf32, #tpu.memory_space<vmem>>, %arg5: memref<128x384xf32, #tpu.memory_space<vmem>>, %arg6: memref<1x384xf32, #tpu.memory_space<vmem>>, %arg7: memref<3x128x128xf32, #tpu.memory_space<vmem>>, %arg8: memref<3x1x128xf32, #tpu.memory_space<vmem>>, %arg9: memref<3x128x128xf32, #tpu.memory_space<vmem>>, %arg10: memref<3x1x128xf32, #tpu.memory_space<vmem>>, %arg11: memref<8x128xf32, #tpu.memory_space<vmem>>) attributes {dimension_semantics = [#tpu.dimension_semantics<parallel>], iteration_bounds = array<i64: 1>, scalar_prefetch = 0 : i64, scratch_operands = 0 : i64, tpu.core_type = #tpu.core_type<tc>, window_params = [{transform_indices = @transform_0, window_bounds = array<i64: 8, 128>}, {transform_indices = @transform_1, window_bounds = array<i64: 8, 1>}, {pipeline_mode = #tpu.pipeline_mode<synchronous>, transform_indices = @transform_2, window_bounds = array<i64: 1, 128>}, {pipeline_mode = #tpu.pipeline_mode<synchronous>, transform_indices = @transform_3, window_bounds = array<i64: 128, 384>}, {pipeline_mode = #tpu.pipeline_mode<synchronous>, transform_indices = @transform_4, window_bounds = array<i64: 128, 384>}, {pipeline_mode = #tpu.pipeline_mode<synchronous>, transform_indices = @transform_5, window_bounds = array<i64: 1, 384>}, {pipeline_mode = #tpu.pipeline_mode<synchronous>, transform_indices = @transform_6, window_bounds = array<i64: 3, 128, 128>}, {pipeline_mode = #tpu.pipeline_mode<synchronous>, transform_indices = @transform_7, window_bounds = array<i64: 3, 1, 128>}, {pipeline_mode = #tpu.pipeline_mode<synchronous>, transform_indices = @transform_8, window_bounds = array<i64: 3, 128, 128>}, {pipeline_mode = #tpu.pipeline_mode<synchronous>, transform_indices = @transform_9, window_bounds = array<i64: 3, 1, 128>}, {transform_indices = @transform_10, window_bounds = array<i64: 8, 128>}]} {
    %c0 = arith.constant 0 : index
    %c0_0 = arith.constant 0 : index
    %0 = vector.load %arg2[%c0, %c0_0] : memref<8x1xf32, #tpu.memory_space<vmem>>, vector<8x1xf32>
    %c0_1 = arith.constant 0 : index
    %c0_2 = arith.constant 0 : index
    %1 = vector.load %arg3[%c0_1, %c0_2] : memref<1x128xf32, #tpu.memory_space<vmem>>, vector<1x128xf32>
    %2 = vector.broadcast %0 : vector<8x1xf32> to vector<8x128xf32>
    %3 = vector.broadcast %1 : vector<1x128xf32> to vector<8x128xf32>
    %4 = arith.mulf %2, %3 : vector<8x128xf32>
    %5 = math.cos %4 : vector<8x128xf32>
    %6 = math.sin %4 : vector<8x128xf32>
    %c0_3 = arith.constant 0 : index
    %c0_4 = arith.constant 0 : index
    %7 = vector.load %arg4[%c0_3, %c0_4] : memref<128x384xf32, #tpu.memory_space<vmem>>, vector<128x384xf32>
    %cst = arith.constant dense<0.000000e+00> : vector<8x384xf32>
    %8 = tpu.matmul %5, %7, %cst {dimension_numbers = #tpu.dot_dimension_numbers<[1], [0], [0], [1], [0, 0, 1, 1], [], []>} : vector<8x128xf32>, vector<128x384xf32>, vector<8x384xf32> -> vector<8x384xf32>
    %c0_5 = arith.constant 0 : index
    %c0_6 = arith.constant 0 : index
    %9 = vector.load %arg5[%c0_5, %c0_6] : memref<128x384xf32, #tpu.memory_space<vmem>>, vector<128x384xf32>
    %cst_7 = arith.constant dense<0.000000e+00> : vector<8x384xf32>
    %10 = tpu.matmul %6, %9, %cst_7 {dimension_numbers = #tpu.dot_dimension_numbers<[1], [0], [0], [1], [0, 0, 1, 1], [], []>} : vector<8x128xf32>, vector<128x384xf32>, vector<8x384xf32> -> vector<8x384xf32>
    %11 = arith.addf %8, %10 : vector<8x384xf32>
    %c0_8 = arith.constant 0 : index
    %c0_9 = arith.constant 0 : index
    %12 = vector.load %arg6[%c0_8, %c0_9] : memref<1x384xf32, #tpu.memory_space<vmem>>, vector<1x384xf32>
    %13 = vector.broadcast %12 : vector<1x384xf32> to vector<8x384xf32>
    %14 = arith.addf %11, %13 : vector<8x384xf32>
    %15 = arith.negf %14 : vector<8x384xf32>
    %16 = math.exp %15 : vector<8x384xf32>
    %cst_10 = arith.constant 1.000000e+00 : f32
    %17 = vector.broadcast %cst_10 : f32 to vector<8x384xf32>
    %18 = arith.addf %17, %16 : vector<8x384xf32>
    %19 = arith.divf %17, %18 : vector<8x384xf32>
    %20 = arith.mulf %14, %19 : vector<8x384xf32>
    %c0_11 = arith.constant 0 : index
    %c0_12 = arith.constant 0 : index
    %21 = vector.load %arg1[%c0_11, %c0_12] : memref<8x128xf32, #tpu.memory_space<vmem>>, vector<8x128xf32>
    %c0_13 = arith.constant 0 : index
    %c0_14 = arith.constant 0 : index
    %c0_15 = arith.constant 0 : index
    %22 = vector.load %arg7[%c0_13, %c0_14, %c0_15] : memref<3x128x128xf32, #tpu.memory_space<vmem>>, vector<1x128x128xf32>
    %23 = vector.shape_cast %22 : vector<1x128x128xf32> to vector<128x128xf32>
    %cst_16 = arith.constant dense<0.000000e+00> : vector<8x128xf32>
    %24 = tpu.matmul %21, %23, %cst_16 {dimension_numbers = #tpu.dot_dimension_numbers<[1], [0], [0], [1], [0, 0, 1, 1], [], []>} : vector<8x128xf32>, vector<128x128xf32>, vector<8x128xf32> -> vector<8x128xf32>
    %c0_17 = arith.constant 0 : index
    %c0_18 = arith.constant 0 : index
    %c0_19 = arith.constant 0 : index
    %25 = vector.load %arg8[%c0_17, %c0_18, %c0_19] : memref<3x1x128xf32, #tpu.memory_space<vmem>>, vector<1x1x128xf32>
    %26 = vector.shape_cast %25 : vector<1x1x128xf32> to vector<1x128xf32>
    %27 = vector.broadcast %26 : vector<1x128xf32> to vector<8x128xf32>
    %28 = arith.addf %24, %27 : vector<8x128xf32>
    %29 = vector.extract_strided_slice %20 {offsets = [0, 0], sizes = [8, 128], strides = [1, 1]} : vector<8x384xf32> to vector<8x128xf32>
    %c0_20 = arith.constant 0 : index
    %c0_21 = arith.constant 0 : index
    %c0_22 = arith.constant 0 : index
    %30 = vector.load %arg9[%c0_20, %c0_21, %c0_22] : memref<3x128x128xf32, #tpu.memory_space<vmem>>, vector<1x128x128xf32>
    %31 = vector.shape_cast %30 : vector<1x128x128xf32> to vector<128x128xf32>
    %cst_23 = arith.constant dense<0.000000e+00> : vector<8x128xf32>
    %32 = tpu.matmul %29, %31, %cst_23 {dimension_numbers = #tpu.dot_dimension_numbers<[1], [0], [0], [1], [0, 0, 1, 1], [], []>} : vector<8x128xf32>, vector<128x128xf32>, vector<8x128xf32> -> vector<8x128xf32>
    %c0_24 = arith.constant 0 : index
    %c0_25 = arith.constant 0 : index
    %c0_26 = arith.constant 0 : index
    %33 = vector.load %arg10[%c0_24, %c0_25, %c0_26] : memref<3x1x128xf32, #tpu.memory_space<vmem>>, vector<1x1x128xf32>
    %34 = vector.shape_cast %33 : vector<1x1x128xf32> to vector<1x128xf32>
    %35 = vector.broadcast %34 : vector<1x128xf32> to vector<8x128xf32>
    %36 = arith.addf %32, %35 : vector<8x128xf32>
    %37 = arith.mulf %36, %28 : vector<8x128xf32>
    %cst_27 = arith.constant 0.000000e+00 : f32
    %38 = vector.broadcast %cst_27 : f32 to vector<8x128xf32>
    %39 = arith.maximumf %37, %38 : vector<8x128xf32>
    %c1 = arith.constant 1 : index
    %c0_28 = arith.constant 0 : index
    %c0_29 = arith.constant 0 : index
    %40 = vector.load %arg7[%c1, %c0_28, %c0_29] : memref<3x128x128xf32, #tpu.memory_space<vmem>>, vector<1x128x128xf32>
    %41 = vector.shape_cast %40 : vector<1x128x128xf32> to vector<128x128xf32>
    %cst_30 = arith.constant dense<0.000000e+00> : vector<8x128xf32>
    %42 = tpu.matmul %39, %41, %cst_30 {dimension_numbers = #tpu.dot_dimension_numbers<[1], [0], [0], [1], [0, 0, 1, 1], [], []>} : vector<8x128xf32>, vector<128x128xf32>, vector<8x128xf32> -> vector<8x128xf32>
    %c1_31 = arith.constant 1 : index
    %c0_32 = arith.constant 0 : index
    %c0_33 = arith.constant 0 : index
    %43 = vector.load %arg8[%c1_31, %c0_32, %c0_33] : memref<3x1x128xf32, #tpu.memory_space<vmem>>, vector<1x1x128xf32>
    %44 = vector.shape_cast %43 : vector<1x1x128xf32> to vector<1x128xf32>
    %45 = vector.broadcast %44 : vector<1x128xf32> to vector<8x128xf32>
    %46 = arith.addf %42, %45 : vector<8x128xf32>
    %47 = vector.extract_strided_slice %20 {offsets = [0, 128], sizes = [8, 128], strides = [1, 1]} : vector<8x384xf32> to vector<8x128xf32>
    %c1_34 = arith.constant 1 : index
    %c0_35 = arith.constant 0 : index
    %c0_36 = arith.constant 0 : index
    %48 = vector.load %arg9[%c1_34, %c0_35, %c0_36] : memref<3x128x128xf32, #tpu.memory_space<vmem>>, vector<1x128x128xf32>
    %49 = vector.shape_cast %48 : vector<1x128x128xf32> to vector<128x128xf32>
    %cst_37 = arith.constant dense<0.000000e+00> : vector<8x128xf32>
    %50 = tpu.matmul %47, %49, %cst_37 {dimension_numbers = #tpu.dot_dimension_numbers<[1], [0], [0], [1], [0, 0, 1, 1], [], []>} : vector<8x128xf32>, vector<128x128xf32>, vector<8x128xf32> -> vector<8x128xf32>
    %c1_38 = arith.constant 1 : index
    %c0_39 = arith.constant 0 : index
    %c0_40 = arith.constant 0 : index
    %51 = vector.load %arg10[%c1_38, %c0_39, %c0_40] : memref<3x1x128xf32, #tpu.memory_space<vmem>>, vector<1x1x128xf32>
    %52 = vector.shape_cast %51 : vector<1x1x128xf32> to vector<1x128xf32>
    %53 = vector.broadcast %52 : vector<1x128xf32> to vector<8x128xf32>
    %54 = arith.addf %50, %53 : vector<8x128xf32>
    %55 = arith.mulf %54, %46 : vector<8x128xf32>
    %cst_41 = arith.constant 0.000000e+00 : f32
    %56 = vector.broadcast %cst_41 : f32 to vector<8x128xf32>
    %57 = arith.maximumf %55, %56 : vector<8x128xf32>
    %c2 = arith.constant 2 : index
    %c0_42 = arith.constant 0 : index
    %c0_43 = arith.constant 0 : index
    %58 = vector.load %arg7[%c2, %c0_42, %c0_43] : memref<3x128x128xf32, #tpu.memory_space<vmem>>, vector<1x128x128xf32>
    %59 = vector.shape_cast %58 : vector<1x128x128xf32> to vector<128x128xf32>
    %cst_44 = arith.constant dense<0.000000e+00> : vector<8x128xf32>
    %60 = tpu.matmul %57, %59, %cst_44 {dimension_numbers = #tpu.dot_dimension_numbers<[1], [0], [0], [1], [0, 0, 1, 1], [], []>} : vector<8x128xf32>, vector<128x128xf32>, vector<8x128xf32> -> vector<8x128xf32>
    %c2_45 = arith.constant 2 : index
    %c0_46 = arith.constant 0 : index
    %c0_47 = arith.constant 0 : index
    %61 = vector.load %arg8[%c2_45, %c0_46, %c0_47] : memref<3x1x128xf32, #tpu.memory_space<vmem>>, vector<1x1x128xf32>
    %62 = vector.shape_cast %61 : vector<1x1x128xf32> to vector<1x128xf32>
    %63 = vector.broadcast %62 : vector<1x128xf32> to vector<8x128xf32>
    %64 = arith.addf %60, %63 : vector<8x128xf32>
    %65 = vector.extract_strided_slice %20 {offsets = [0, 256], sizes = [8, 128], strides = [1, 1]} : vector<8x384xf32> to vector<8x128xf32>
    %c2_48 = arith.constant 2 : index
    %c0_49 = arith.constant 0 : index
    %c0_50 = arith.constant 0 : index
    %66 = vector.load %arg9[%c2_48, %c0_49, %c0_50] : memref<3x128x128xf32, #tpu.memory_space<vmem>>, vector<1x128x128xf32>
    %67 = vector.shape_cast %66 : vector<1x128x128xf32> to vector<128x128xf32>
    %cst_51 = arith.constant dense<0.000000e+00> : vector<8x128xf32>
    %68 = tpu.matmul %65, %67, %cst_51 {dimension_numbers = #tpu.dot_dimension_numbers<[1], [0], [0], [1], [0, 0, 1, 1], [], []>} : vector<8x128xf32>, vector<128x128xf32>, vector<8x128xf32> -> vector<8x128xf32>
    %c2_52 = arith.constant 2 : index
    %c0_53 = arith.constant 0 : index
    %c0_54 = arith.constant 0 : index
    %69 = vector.load %arg10[%c2_52, %c0_53, %c0_54] : memref<3x1x128xf32, #tpu.memory_space<vmem>>, vector<1x1x128xf32>
    %70 = vector.shape_cast %69 : vector<1x1x128xf32> to vector<1x128xf32>
    %71 = vector.broadcast %70 : vector<1x128xf32> to vector<8x128xf32>
    %72 = arith.addf %68, %71 : vector<8x128xf32>
    %73 = arith.mulf %72, %64 : vector<8x128xf32>
    %c0_55 = arith.constant 0 : index
    %c0_56 = arith.constant 0 : index
    %74 = vector.load %arg11[%c0_55, %c0_56] : memref<8x128xf32, #tpu.memory_space<vmem>>, vector<8x128xf32>
    tpu.vector_store %arg11[%c0_55, %c0_56], %73 {strides = array<i32>} : memref<8x128xf32, #tpu.memory_space<vmem>>, vector<8x128xf32>,
    return
  }
  func.func @transform_0(%arg0: i32) -> (i32, i32) {
    %c0_i32 = arith.constant 0 : i32
    %c0_i32_0 = arith.constant 0 : i32
    return %arg0, %c0_i32 : i32, i32
  }
  func.func @transform_1(%arg0: i32) -> (i32, i32) {
    %c0_i32 = arith.constant 0 : i32
    %c0_i32_0 = arith.constant 0 : i32
    return %arg0, %c0_i32 : i32, i32
  }
  func.func @transform_2(%arg0: i32) -> (i32, i32) {
    %c0_i32 = arith.constant 0 : i32
    %c0_i32_0 = arith.constant 0 : i32
    %c0_i32_1 = arith.constant 0 : i32
    return %c0_i32, %c0_i32_0 : i32, i32
  }
  func.func @transform_3(%arg0: i32) -> (i32, i32) {
    %c0_i32 = arith.constant 0 : i32
    %c0_i32_0 = arith.constant 0 : i32
    %c0_i32_1 = arith.constant 0 : i32
    return %c0_i32, %c0_i32_0 : i32, i32
  }
  func.func @transform_4(%arg0: i32) -> (i32, i32) {
    %c0_i32 = arith.constant 0 : i32
    %c0_i32_0 = arith.constant 0 : i32
    %c0_i32_1 = arith.constant 0 : i32
    return %c0_i32, %c0_i32_0 : i32, i32
  }
  func.func @transform_5(%arg0: i32) -> (i32, i32) {
    %c0_i32 = arith.constant 0 : i32
    %c0_i32_0 = arith.constant 0 : i32
    %c0_i32_1 = arith.constant 0 : i32
    return %c0_i32, %c0_i32_0 : i32, i32
  }
  func.func @transform_6(%arg0: i32) -> (i32, i32, i32) {
    %c0_i32 = arith.constant 0 : i32
    %c0_i32_0 = arith.constant 0 : i32
    %c0_i32_1 = arith.constant 0 : i32
    %c0_i32_2 = arith.constant 0 : i32
    return %c0_i32, %c0_i32_0, %c0_i32_1 : i32, i32, i32
  }
  func.func @transform_7(%arg0: i32) -> (i32, i32, i32) {
    %c0_i32 = arith.constant 0 : i32
    %c0_i32_0 = arith.constant 0 : i32
    %c0_i32_1 = arith.constant 0 : i32
    %c0_i32_2 = arith.constant 0 : i32
    return %c0_i32, %c0_i32_0, %c0_i32_1 : i32, i32, i32
  }
  func.func @transform_8(%arg0: i32) -> (i32, i32, i32) {
    %c0_i32 = arith.constant 0 : i32
    %c0_i32_0 = arith.constant 0 : i32
    %c0_i32_1 = arith.constant 0 : i32
    %c0_i32_2 = arith.constant 0 : i32
    return %c0_i32, %c0_i32_0, %c0_i32_1 : i32, i32, i32
  }
  func.func @transform_9(%arg0: i32) -> (i32, i32, i32) {
    %c0_i32 = arith.constant 0 : i32
    %c0_i32_0 = arith.constant 0 : i32
    %c0_i32_1 = arith.constant 0 : i32
    %c0_i32_2 = arith.constant 0 : i32
    return %c0_i32, %c0_i32_0, %c0_i32_1 : i32, i32, i32
  }
  func.func @transform_10(%arg0: i32) -> (i32, i32) {
    %c0_i32 = arith.constant 0 : i32
    %c0_i32_0 = arith.constant 0 : i32
    return %arg0, %c0_i32 : i32, i32
  }
}

</mosaic_0001>

<bundles_post_ra>
// kernel: _forward_per_row_t.1
= control target key start
LH: loop header
LB: loop body
LE: loop exit
PB: predicated region body
PF: predicated region fallthrough
CT: control target
= control target key end

     0   :  { %15 = vsyncpa [#allocation3], 0  ;;  %s2199_s0 = inlined_call_operand.vmem [shape: f32[8,128], index: 0, kind: input, shape index: {}]   ;;  %s2200_s1 = inlined_call_operand.vmem [shape: f32[8,1], index: 1, kind: input, shape index: {}]   ;;  %s2201_s2 = inlined_call_operand.vmem [shape: f32[1,128], index: 2, kind: input, shape index: {}]   ;;  %s2202_s3 = inlined_call_operand.hbm [shape: f32[128,384], index: 3, kind: input, shape index: {}]   ;;  %s2203_s4 = inlined_call_operand.hbm [shape: f32[128,384], index: 4, kind: input, shape index: {}]   ;;  %s2204_s5 = inlined_call_operand.vmem [shape: f32[1,384], index: 5, kind: input, shape index: {}]   ;;  %s2205_s6 = inlined_call_operand.hbm [shape: f32[3,128,128], index: 6, kind: input, shape index: {}]   ;;  %s2206_s7 = inlined_call_operand.vmem [shape: f32[3,1,128], index: 7, kind: input, shape index: {}]   ;;  %s2207_s8 = inlined_call_operand.hbm [shape: f32[3,128,128], index: 8, kind: input, shape index: {}]   ;;  %s2208_s9 = inlined_call_operand.vmem [shape: f32[3,1,128], index: 9, kind: input, shape index: {}]   ;;  %s2209_s10 = inlined_call_operand.vmem [shape: f32[8,128], index: 10, kind: output, shape index: {}]  }
   0x1   :  { %16 = vsyncpa [#allocation5], 0 }
   0x2   :  { %17 = vsyncpa [#allocation8], 0  ;;  %s1872_s13 = smov [#allocation4]   ;;  %s1873_s15 = smov [#allocation2]  }
   0x3   :  { %s41_s14 = sshll.u32 %s1872_s13, 4  ;;  %s29_s16 = sshll.u32 %s1873_s15, 4  ;;  %s42_s14 = int_to_ptr.vmem [resolvable:$true] %s41_s14  ;;  %s30_s16 = int_to_ptr.vmem [resolvable:$true] %s29_s16 }
   0x4   :  { %s1794_s17 = scalar_lea.vmem %s42_s14, 6144  ;;  %p1799_p1 = scmp.lt.s32.totalorder %s42_s14, %s42_s14 }
   0x5   :  { %p1795_p0 = scmp.ne.s32.totalorder %s42_s14, %s1794_s17  ;;  %p1800_p2 = scmp.lt.s32.totalorder %s1794_s17, %s1794_s17 }
   0x7   :  { %p1801_p3 = por %p1800_p2, %p1799_p1 }
   0x9   :  { %p1802_p4 = pnand %p1801_p3, %p1795_p0 }
   0xb   :  { %1805 = shalt.err (!%p1802_p4)
}
   0xc   :  { %s1874_s18 = smov 384   ;;  %s1875_s19 = smov 24  }
   0xd   :  { %47 = dma.hbm_to_vmem [thread:$0]  %s2203_s4, 6144, %s42_s14, [#allocation5], %s1874_s18, %s1874_s18, %s1875_s19  }
   0xe   :  { %s1814_s22 = scalar_lea.vmem %s30_s16, 6144  ;;  %p1819_p6 = scmp.lt.s32.totalorder %s30_s16, %s30_s16 }
   0xf   :  { %p1815_p5 = scmp.ne.s32.totalorder %s30_s16, %s1814_s22  ;;  %p1820_p7 = scmp.lt.s32.totalorder %s1814_s22, %s1814_s22 }
  0x11   :  { %p1821_p8 = por %p1820_p7, %p1819_p6 }
  0x13   :  { %p1822_p9 = pnand %p1821_p8, %p1815_p5 }
  0x15   :  { %1825 = shalt.err (!%p1822_p9)
}
  0x16   :  { %35 = dma.hbm_to_vmem [thread:$0]  %s2202_s3, 6144, %s30_s16, [#allocation3], %s1874_s18, %s1874_s18, %s1875_s19  }
  0x17   :  { %s1876_s25 = smov [#allocation6]  }
  0x18   :  { %s55_s26 = sshll.u32 %s1876_s25, 4  ;;  %s56_s26 = int_to_ptr.vmem [resolvable:$true] %s55_s26 }
  0x19   :  { %s1834_s27 = scalar_lea.vmem %s56_s26, 6144  ;;  %p1839_p11 = scmp.lt.s32.totalorder %s56_s26, %s56_s26 }
  0x1a   :  { %p1835_p10 = scmp.ne.s32.totalorder %s56_s26, %s1834_s27  ;;  %p1840_p12 = scmp.lt.s32.totalorder %s1834_s27, %s1834_s27 }
  0x1c   :  { %p1841_p13 = por %p1840_p12, %p1839_p11 }
  0x1e   :  { %p1842_p0 = pnand %p1841_p13, %p1835_p10 }
  0x20   :  { %1845 = shalt.err (!%p1842_p0)
}
  0x21   :  { %s1877_s4 = smov 128   ;;  %s1878_s28 = smov 8  }
  0x22   :  { %61 = dma.hbm_to_vmem [thread:$0]  %s2205_s6, 6144, %s56_s26, [#allocation5], %s1877_s4, %s1877_s4, %s1878_s28  }
  0x23   :  { %s1879_s11 = smov [#allocation7]  }
  0x24   :  { %s69_s12 = sshll.u32 %s1879_s11, 4  ;;  %s70_s12 = int_to_ptr.vmem [resolvable:$true] %s69_s12 }
  0x25   :  { %s1854_s3 = scalar_lea.vmem %s70_s12, 6144  ;;  %p1859_p2 = scmp.lt.s32.totalorder %s70_s12, %s70_s12 }
  0x26   :  { %p1855_p1 = scmp.ne.s32.totalorder %s70_s12, %s1854_s3  ;;  %p1860_p3 = scmp.lt.s32.totalorder %s1854_s3, %s1854_s3 }
  0x28   :  { %p1861_p4 = por %p1860_p3, %p1859_p2 }
  0x2a   :  { %p1862_p5 = pnand %p1861_p4, %p1855_p1 }
  0x2c   :  { %1865 = shalt.err (!%p1862_p5)
}
  0x2d   :  { %75 = dma.hbm_to_vmem [thread:$0]  %s2207_s8, 6144, %s70_s12, [#allocation8], %s1877_s4, %s1877_s4, %s1878_s28  }
  0x2e   :  { %1866 = dma.done.wait [#allocation3], 6144  }
  0x2f   :  { %1867 = vsyncadd [#allocation3], 4294961152 }
  0x30   :  { %1868 = dma.done.wait [#allocation5], 12288  }
  0x31   :  { %1869 = vsyncadd [#allocation5], 4294955008 }
  0x32   :  { %1870 = dma.done.wait [#allocation8], 6144  }
  0x33   :  { %1871 = vsyncadd [#allocation8], 4294961152  ;;  %v1880_v0 = vmov 0   ;;  %v90_v1 = vld [vmem:[%s2200_s1] sm:$0xff]  ;;  %v405_v2 = vld [vmem:[#allocation4 + $0x170] sm:$0xff]  ;;  %v1881_v3 = vmov 0.0  }
  0x34   :  { %1769 = vset.pattern.permute.xlu0 %v1880_v0  ;;  %407 = vmatprep.subr.mxu0 %v405_v2  ;;  %v404_v4 = vld [vmem:[#allocation4 + $0x168] sm:$0xff]  ;;  %v406_v5 = vld [vmem:[#allocation4 + $0x178] sm:$0xff]  ;;  %v401_v7 = vld [vmem:[#allocation4 + $0x150] sm:$0xff]  ;;  %vm1882_vm0 = vmmov 0  }
  0x35   :  { %94 = vperm.xlu0 %1769, %v90_v1   ;;  %1468 = vmatprep.subr.mxu1 %v1881_v3  ;;  %v402_v6 = vld [vmem:[#allocation4 + $0x158] sm:$0xff]  ;;  %v403_v8 = vld [vmem:[#allocation4 + $0x160] sm:$0xff]  ;;  %v400_v11 = vld [vmem:[#allocation4 + $0x148] sm:$0xff]  ;;  %v1883_v1 = vmov 683565275  }
  0x36   :  { %408 = vmatpush1.msra.mxu0 %v404_v4  ;;  %1469 = vmatpush3.msra.mxu1 %v406_v5  ;;  %v399_v9 = vld [vmem:[#allocation4 + $0x140] sm:$0xff]  ;;  %v398_v10 = vld [vmem:[#allocation4 + $0x138] sm:$0xff]  ;;  %v396_v12 = vld [vmem:[#allocation4 + $0x128] sm:$0xff]  ;;  %v1884_v4 = vmov 2475754826  }
  0x37   :  { %409 = vmatprep.subr.mxu0 %v402_v6  ;;  %1470 = vmatprep.subr.mxu1 %v1881_v3  ;;  %v395_v13 = vld [vmem:[#allocation4 + $0x120] sm:$0xff]  ;;  %v397_v14 = vld [vmem:[#allocation4 + $0x130] sm:$0xff]  ;;  %v392_v16 = vld [vmem:[#allocation4 + $0x108] sm:$0xff] }
  0x38   :  { %410 = vmatpush1.msra.mxu0 %v401_v7  ;;  %1471 = vmatpush3.msra.mxu1 %v403_v8  ;;  %v393_v15 = vld [vmem:[#allocation4 + $0x110] sm:$0xff]  ;;  %v394_v17 = vld [vmem:[#allocation4 + $0x118] sm:$0xff]  ;;  %v391_v20 = vld [vmem:[#allocation4 + $0x100] sm:$0xff]  ;;  %v1885_v7 = vmov 2131351028  }
  0x39   :  { %411 = vmatprep.subr.mxu0 %v399_v9  ;;  %1472 = vmatprep.subr.mxu1 %v1881_v3  ;;  %v390_v18 = vld [vmem:[#allocation4 + $0xf8] sm:$0xff]  ;;  %v389_v19 = vld [vmem:[#allocation4 + $0xf0] sm:$0xff]  ;;  %v387_v21 = vld [vmem:[#allocation4 + $0xe0] sm:$0xff] }
  0x3a   :  { %412 = vmatpush1.msra.mxu0 %v398_v10  ;;  %1473 = vmatpush3.msra.mxu1 %v400_v11  ;;  %v386_v22 = vld [vmem:[#allocation4 + $0xd8] sm:$0xff]  ;;  %v388_v23 = vld [vmem:[#allocation4 + $0xe8] sm:$0xff]  ;;  %v383_v25 = vld [vmem:[#allocation4 + $0xc0] sm:$0xff]  ;;  %v1886_v10 = vmov 2102212464  }
  0x3b   :  { %413 = vmatprep.subr.mxu0 %v396_v12  ;;  %1474 = vmatprep.subr.mxu1 %v1881_v3  ;;  %v384_v24 = vld [vmem:[#allocation4 + $0xc8] sm:$0xff]  ;;  %v385_v26 = vld [vmem:[#allocation4 + $0xd0] sm:$0xff]  ;;  %v382_v29 = vld [vmem:[#allocation4 + $0xb8] sm:$0xff] }
  0x3c   :  { %414 = vmatpush1.msra.mxu0 %v395_v13  ;;  %1475 = vmatpush3.msra.mxu1 %v397_v14  ;;  %v381_v27 = vld [vmem:[#allocation4 + $0xb0] sm:$0xff]  ;;  %v380_v28 = vld [vmem:[#allocation4 + $0xa8] sm:$0xff]  ;;  %v378_v30 = vld [vmem:[#allocation4 + $0x98] sm:$0xff]  ;;  %v1887_v13 = vmov 920167782  }
  0x3d   :  { %415 = vmatprep.subr.mxu0 %v393_v15  ;;  %1476 = vmatprep.subr.mxu1 %v1881_v3  ;;  %v377_v31 = vld [vmem:[#allocation4 + $0x90] sm:$0xff]  ;;  %v379_v32 = vld [vmem:[#allocation4 + $0xa0] sm:$0xff]  ;;  %v374_v34 = vld [vmem:[#allocation4 + $0x78] sm:$0xff] }
  0x3e   :  { %416 = vmatpush1.msra.mxu0 %v392_v16  ;;  %1477 = vmatpush3.msra.mxu1 %v394_v17  ;;  %v375_v33 = vld [vmem:[#allocation4 + $0x80] sm:$0xff]  ;;  %v376_v35 = vld [vmem:[#allocation4 + $0x88] sm:$0xff]  ;;  %v373_v38 = vld [vmem:[#allocation4 + $0x70] sm:$0xff]  ;;  %v1888_v16 = vmov 1326507024  }
  0x3f   :  { %417 = vmatprep.subr.mxu0 %v390_v18  ;;  %1478 = vmatprep.subr.mxu1 %v1881_v3  ;;  %v372_v36 = vld [vmem:[#allocation4 + $0x68] sm:$0xff]  ;;  %v371_v37 = vld [vmem:[#allocation4 + $0x60] sm:$0xff]  ;;  %v369_v39 = vld [vmem:[#allocation4 + $0x50] sm:$0xff] }
  0x40   :  { %418 = vmatpush1.msra.mxu0 %v389_v19  ;;  %1479 = vmatpush3.msra.mxu1 %v391_v20  ;;  %v368_v40 = vld [vmem:[#allocation4 + $0x48] sm:$0xff]  ;;  %v370_v41 = vld [vmem:[#allocation4 + $0x58] sm:$0xff]  ;;  %v365_v43 = vld [vmem:[#allocation4 + $0x30] sm:$0xff] }
  0x41   :  { %419 = vmatprep.subr.mxu0 %v387_v21  ;;  %1480 = vmatprep.subr.mxu1 %v1881_v3  ;;  %v366_v42 = vld [vmem:[#allocation4 + $0x38] sm:$0xff]  ;;  %v367_v44 = vld [vmem:[#allocation4 + $0x40] sm:$0xff]  ;;  %v364_v47 = vld [vmem:[#allocation4 + $0x28] sm:$0xff] }
  0x42   :  { %420 = vmatpush1.msra.mxu0 %v386_v22  ;;  %1481 = vmatpush3.msra.mxu1 %v388_v23  ;;  %v363_v45 = vld [vmem:[#allocation4 + $0x20] sm:$0xff]  ;;  %v362_v46 = vld [vmem:[#allocation4 + $0x18] sm:$0xff]  ;;  %v360_v48 = vld [vmem:[#allocation4 + $0x8] sm:$0xff] }
  0x43   :  { %421 = vmatprep.subr.mxu0 %v384_v24  ;;  %1482 = vmatprep.subr.mxu1 %v1881_v3  ;;  %v359_v49 = vld [vmem:[#allocation4] sm:$0xff]  ;;  %v361_v50 = vld [vmem:[#allocation4 + $0x10] sm:$0xff] }
  0x44   :  { %422 = vmatpush1.msra.mxu0 %v383_v25  ;;  %1483 = vmatpush3.msra.mxu1 %v385_v26  ;;  %v357_v51 = vld [vmem:[#allocation2 + $0x170] sm:$0xff]  ;;  %v1310_v52 = vld [vmem:[%s2201_s2] ss:$0 sm:$0xff] }
  0x45   :  { %423 = vmatprep.subr.mxu0 %v381_v27  ;;  %1484 = vmatprep.subr.mxu1 %v1881_v3 }
  0x46   :  { %424 = vmatpush1.msra.mxu0 %v380_v28  ;;  %1485 = vmatpush3.msra.mxu1 %v382_v29 }
  0x47   :  { %425 = vmatprep.subr.mxu0 %v378_v30  ;;  %1486 = vmatprep.subr.mxu1 %v1881_v3 }
  0x48   :  { %426 = vmatpush1.msra.mxu0 %v377_v31  ;;  %1487 = vmatpush3.msra.mxu1 %v379_v32 }
  0x49   :  { %427 = vmatprep.subr.mxu0 %v375_v33  ;;  %1488 = vmatprep.subr.mxu1 %v1881_v3 }
  0x4a   :  { %428 = vmatpush1.msra.mxu0 %v374_v34  ;;  %1489 = vmatpush3.msra.mxu1 %v376_v35 }
  0x4b   :  { %429 = vmatprep.subr.mxu0 %v372_v36  ;;  %1490 = vmatprep.subr.mxu1 %v1881_v3 }
  0x4c   :  { %430 = vmatpush1.msra.mxu0 %v371_v37  ;;  %1491 = vmatpush3.msra.mxu1 %v373_v38 }
  0x4d   :  { %431 = vmatprep.subr.mxu0 %v369_v39  ;;  %1492 = vmatprep.subr.mxu1 %v1881_v3 }
  0x4e   :  { %432 = vmatpush1.msra.mxu0 %v368_v40  ;;  %1493 = vmatpush3.msra.mxu1 %v370_v41 }
  0x4f   :  { %433 = vmatprep.subr.mxu0 %v366_v42  ;;  %1494 = vmatprep.subr.mxu1 %v1881_v3 }
  0x50   :  { %434 = vmatpush1.msra.mxu0 %v365_v43  ;;  %1495 = vmatpush3.msra.mxu1 %v367_v44 }
  0x51   :  { %435 = vmatprep.subr.mxu0 %v363_v45  ;;  %1496 = vmatprep.subr.mxu1 %v1881_v3 }
  0x52   :  { %436 = vmatpush1.msra.mxu0 %v362_v46  ;;  %1497 = vmatpush3.msra.mxu1 %v364_v47 }
  0x53   :  { %437 = vmatprep.subr.mxu0 %v360_v48  ;;  %1498 = vmatprep.subr.mxu1 %v1881_v3 }
  0x54   :  { %438 = vmatpush1.msra.mxu0 %v359_v49  ;;  %1499 = vmatpush3.msra.mxu1 %v361_v50 }
  0x55   :  { %471 = vmatprep.mubr.f32.mxu0 %v1881_v3  ;;  %1500 = vmatprep.mubr.msk.f32.mxu1 %vm1882_vm0, %v1881_v3 }
  0x56   :  { %548 = vmatprep.subr.mxu0 %v357_v51  ;;  %1503 = vmatprep.subr.mxu1 %v1881_v3 }
  0xb0   :  { %v95_v53 = vpop.permute.xlu0 %94 }
  0xb1   :  { %v1982_v54 = vmul.f32 %v1310_v52, %v95_v53 }
  0xb3   :  { %v107_v55 = vand.u32 2139095040, %v1982_v54  ;;  %v104_v59 = vand.u32 2147483647, %v1982_v54  ;;  %vm106_vm8 = vcmp.lt.s32.totalorder %v1982_v54, 0  ;;  %vm196_vm13 = vweird.f32 %v1982_v54 }
  0xb5   :  { %v108_v56 = vshrl.u32 %v107_v55, 23  ;;  %v111_v62 = vand.u32 8388607, %v104_v59  ;;  %vm105_vm9 = vcmp.le.f32.partialorder %v104_v59, 0.7853982 }
  0xb7   :  { %v1311_v57 = vadd.s32 4294967169, %v108_v56  ;;  %v112_v18 = vor.u32 8388608, %v111_v62 }
  0xb9   :  { %v114_v58 = vadd.s32 1, %v1311_v57  ;;  %v152_v32 = vshll.u32 %v112_v18, 8 }
  0xbb   :  { %vm115_vm1 = vcmp.gt.s32.totalorder %v114_v58, 0 }
  0xbc   :  { %v116_v60 = vsel %vm115_vm1, %v114_v58, 0 }
  0xbd   :  { %v118_v61 = vand.u32 31, %v116_v60  ;;  %v117_v0 = vshrl.u32 %v116_v60, 5 }
  0xbf   :  { %v119_v63 = vsub.s32 32, %v118_v61  ;;  %v121_v2 = vshll.u32 %v1883_v1, %v118_v61  ;;  %v124_v5 = vshll.u32 %v1884_v4, %v118_v61  ;;  %v127_v9 = vshll.u32 %v1885_v7, %v118_v61 }
  0xc0   :  { %v130_v12 = vshll.u32 %v1886_v10, %v118_v61  ;;  %v133_v15 = vshll.u32 %v1887_v13, %v118_v61  ;;  %vm136_vm2 = vcmp.lt.s32.totalorder %v117_v0, 1  ;;  %vm139_vm3 = vcmp.lt.s32.totalorder %v117_v0, 4 }
  0xc1   :  { %v122_v6 = vshrl.u32 %v1884_v4, %v119_v63  ;;  %v125_v8 = vshrl.u32 %v1885_v7, %v119_v63  ;;  %v128_v11 = vshrl.u32 %v1886_v10, %v119_v63  ;;  %v131_v14 = vshrl.u32 %v1887_v13, %v119_v63 }
  0xc2   :  { %v134_v17 = vshrl.u32 %v1888_v16, %v119_v63  ;;  %v120_v27 = vshrl.u32 %v1883_v1, %v119_v63  ;;  %vm138_vm4 = vcmp.lt.s32.totalorder %v117_v0, 3  ;;  %vm137_vm5 = vcmp.lt.s32.totalorder %v117_v0, 2 }
  0xc3   :  { %v123_v19 = vor.u32 %v122_v6, %v121_v2  ;;  %v126_v20 = vor.u32 %v125_v8, %v124_v5  ;;  %v129_v21 = vor.u32 %v128_v11, %v127_v9  ;;  %v132_v22 = vor.u32 %v131_v14, %v130_v12 }
  0xc4   :  { %v135_v23 = vor.u32 %v134_v17, %v133_v15 }
  0xc5   :  { %v141_v24 = vsel %vm139_vm3, %v129_v21, 2102212464  ;;  %v144_v25 = vsel %vm136_vm2, %v123_v19, %v126_v20  ;;  %v148_v26 = vsel %vm136_vm2, %v126_v20, %v129_v21  ;;  %v145_v28 = vsel %vm139_vm3, %v132_v22, 920167782 }
  0xc6   :  { %v149_v29 = vsel %vm139_vm3, %v135_v23, 1326507024  ;;  %v146_v30 = vsel %vm138_vm4, %v129_v21, %v145_v28  ;;  %v140_v33 = vsel %vm136_vm2, %v120_v27, %v123_v19  ;;  %v142_v34 = vsel %vm138_vm4, %v126_v20, %v141_v24  ;;  %v356_v20 = vld [vmem:[#allocation2 + $0x168] sm:$0xff]  ;;  %v358_v21 = vld [vmem:[#allocation2 + $0x178] sm:$0xff]  ;;  %v353_v24 = vld [vmem:[#allocation2 + $0x150] sm:$0xff] }
  0xc7   :  { %v150_v31 = vsel %vm138_vm4, %v132_v22, %v149_v29  ;;  %v147_v35 = vsel %vm137_vm5, %v144_v25, %v146_v30  ;;  %v143_v41 = vsel %vm137_vm5, %v140_v33, %v142_v34  ;;  %v354_v23 = vld [vmem:[#allocation2 + $0x158] sm:$0xff]  ;;  %v355_v25 = vld [vmem:[#allocation2 + $0x160] sm:$0xff]  ;;  %v352_v28 = vld [vmem:[#allocation2 + $0x148] sm:$0xff] }
  0xc8   :  { %v151_v36 = vsel %vm137_vm5, %v148_v26, %v150_v31  ;;  %v1991_v39 = vmul.u32.u64.low %v152_v32, %v147_v35  ;;  %v1992_v40 = vmul.u32.u64.high %v152_v32, %v147_v35, %v1991_v39  ;;  %v159_v43 = vmul.u32 %v152_v32, %v143_v41  ;;  %v351_v26 = vld [vmem:[#allocation2 + $0x140] sm:$0xff]  ;;  %v350_v27 = vld [vmem:[#allocation2 + $0x138] sm:$0xff]  ;;  %v348_v29 = vld [vmem:[#allocation2 + $0x128] sm:$0xff] }
  0xc9   :  { %v1988_v37 = vmul.u32.u64.low %v152_v32, %v151_v36  ;;  %v1989_v38 = vmul.u32.u64.high %v152_v32, %v151_v36, %v1988_v37  ;;  %v347_v30 = vld [vmem:[#allocation2 + $0x120] sm:$0xff]  ;;  %v349_v31 = vld [vmem:[#allocation2 + $0x130] sm:$0xff]  ;;  %v344_v33 = vld [vmem:[#allocation2 + $0x108] sm:$0xff] }
  0xca   :  { %v162_v42 = vadd.s32 1, %v1992_v40  ;;  %v345_v32 = vld [vmem:[#allocation2 + $0x110] sm:$0xff]  ;;  %v346_v34 = vld [vmem:[#allocation2 + $0x118] sm:$0xff]  ;;  %v343_v37 = vld [vmem:[#allocation2 + $0x100] sm:$0xff] }
  0xcb   :  { %vm161_vm6 = vc.u32 %v1989_v38, %v1991_v39  ;;  %v160_v56 = vadd.s32 %v1991_v39, %v1989_v38  ;;  %v342_v35 = vld [vmem:[#allocation2 + $0xf8] sm:$0xff]  ;;  %v341_v36 = vld [vmem:[#allocation2 + $0xf0] sm:$0xff]  ;;  %v339_v38 = vld [vmem:[#allocation2 + $0xe0] sm:$0xff] }
  0xcc   :  { %v163_v44 = vsel %vm161_vm6, %v162_v42, %v1992_v40  ;;  %v338_v39 = vld [vmem:[#allocation2 + $0xd8] sm:$0xff]  ;;  %v340_v40 = vld [vmem:[#allocation2 + $0xe8] sm:$0xff]  ;;  %v335_v42 = vld [vmem:[#allocation2 + $0xc0] sm:$0xff] }
  0xcd   :  { %v164_v45 = vadd.s32 %v163_v44, %v159_v43  ;;  %v336_v41 = vld [vmem:[#allocation2 + $0xc8] sm:$0xff]  ;;  %v337_v43 = vld [vmem:[#allocation2 + $0xd0] sm:$0xff] }
  0xce   :  { %v333_v44 = vld [vmem:[#allocation2 + $0xb0] sm:$0xff] }
  0xcf   :  { %v165_v46 = vadd.s32 536870912, %v164_v45 }
  0xd1   :  { %v166_v47 = vshrl.u32 %v165_v46, 30  ;;  %v334_v46 = vld [vmem:[#allocation2 + $0xb8] sm:$0xff] }
  0xd3   :  { %v167_v48 = vshll.u32 %v166_v47, 30  ;;  %v190_v7 = vsub.s32 4, %v166_v47 }
  0xd5   :  { %v168_v49 = vsub.s32 %v164_v45, %v167_v48  ;;  %v191_v10 = vsel %vm106_vm8, %v190_v7, %v166_v47  ;;  %v332_v45 = vld [vmem:[#allocation2 + $0xa8] sm:$0xff]  ;;  %v330_v47 = vld [vmem:[#allocation2 + $0x98] sm:$0xff]  ;;  %v329_v48 = vld [vmem:[#allocation2 + $0x90] sm:$0xff] }
  0xd6   :  { %v2002_v11 = vsel %vm105_vm9, 0, %v191_v10  ;;  %v312_v7 = vld [vmem:[#allocation2 + $0x8] sm:$0xff] }
  0xd7   :  { %v170_v50 = vsub.s32 0, %v168_v49  ;;  %v300_v12 = vadd.s32 3, %v2002_v11 }
  0xd9   :  { %v1312_v51 = vmin.u32 %v170_v50, %v168_v49  ;;  %v301_v13 = vand.u32 3, %v300_v12  ;;  %v327_v50 = vld [vmem:[#allocation2 + $0x80] sm:$0xff]  ;;  %v691_v12 = vlaneseq }
  0xdb   :  { %v172_v52 = vclz %v1312_v51  ;;  %vm306_vm10 = vcmp.eq.s32.totalorder %v301_v13, 2  ;;  %vm303_vm11 = vcmp.eq.s32.totalorder %v301_v13, 0  ;;  %vm302_vm12 = vcmp.lt.s32.totalorder %v301_v13, 2  ;;  %v326_v51 = vld [vmem:[#allocation2 + $0x78] sm:$0xff] }
  0xdc   :  { %v2053_v13 = vshrl.u32 %v691_v12, 7 }
  0xdd   :  { %v1313_v53 = vadd.s32 4294967294, %v172_v52  ;;  %v328_v52 = vld [vmem:[#allocation2 + $0x88] sm:$0xff] }
  0xdf   :  { %vm1314_vm7 = vcmp.lt.s32.totalorder %v1313_v53, 0 }
  0xe0   :  { %v175_v55 = vsel %vm1314_vm7, 0, %v1313_v53  ;;  %v324_v53 = vld [vmem:[#allocation2 + $0x68] sm:$0xff] }
  0xe1   :  { %v176_v57 = vsub.s32 32, %v175_v55  ;;  %v180_v58 = vsub.s32 4294967266, %v175_v55  ;;  %v177_v60 = vshll.u32 %v168_v49, %v175_v55  ;;  %v331_v49 = vld [vmem:[#allocation2 + $0xa0] sm:$0xff] }
  0xe2   :  { %v323_v55 = vld [vmem:[#allocation2 + $0x60] sm:$0xff] }
  0xe3   :  { %v178_v61 = vshrl.u32 %v160_v56, %v176_v57  ;;  %v181_v62 = vadd.s32 127, %v180_v58  ;;  %v325_v56 = vld [vmem:[#allocation2 + $0x70] sm:$0xff]  ;;  %v197_v58 = vand.u32 3, %v2002_v11 }
  0xe4   :  { %v321_v57 = vld [vmem:[#allocation2 + $0x50] sm:$0xff] }
  0xe5   :  { %v179_v63 = vor.u32 %v178_v61, %v177_v60  ;;  %v182_v0 = vshll.u32 %v181_v62, 23  ;;  %v320_v60 = vld [vmem:[#allocation2 + $0x48] sm:$0xff]  ;;  %v322_v61 = vld [vmem:[#allocation2 + $0x58] sm:$0xff]  ;;  %vm199_vm14 = vcmp.eq.s32.totalorder %v197_v58, 0  ;;  %vm202_vm15 = vcmp.eq.s32.totalorder %v197_v58, 2 }
  0xe6   :  { %v318_v62 = vld [vmem:[#allocation2 + $0x38] sm:$0xff]  ;;  %vm198_vm1 = vcmp.lt.s32.totalorder %v197_v58, 2  ;;  %v928_v58 = vld [vmem:[#allocation6 + $0xc0] sm:$0xff] }
  0xe7   :  { %v183_v1 = vor.u32 4788187, %v182_v0  ;;  %v186_v4 = vcvt.s32.f32 %v179_v63  ;;  %v317_v63 = vld [vmem:[#allocation2 + $0x30] sm:$0xff]  ;;  %v319_v0 = vld [vmem:[#allocation2 + $0x40] sm:$0xff] }
  0xe9   :  { %v184_v2 = vand.u32 2147483647, %v183_v1  ;;  %v315_v1 = vld [vmem:[#allocation2 + $0x20] sm:$0xff] }
  0xeb   :  { %v187_v5 = vmul.f32 %v186_v4, %v184_v2  ;;  %v314_v2 = vld [vmem:[#allocation2 + $0x18] sm:$0xff]  ;;  %v316_v4 = vld [vmem:[#allocation2 + $0x28] sm:$0xff] }
  0xed   :  { %v188_v6 = vxor.u32 2147483648, %v187_v5 }
  0xef   :  { %v189_v8 = vsel %vm106_vm8, %v188_v6, %v187_v5 }
  0xf0   :  { %v192_v9 = vsel %vm105_vm9, %v1982_v54, %v189_v8  ;;  %v311_v8 = vld [vmem:[#allocation2] sm:$0xff] }
  0xf1   :  { %1770 = vcosq.f32 %v192_v9  ;;  %v2059_v54 = vld [vmem:[%s2204_s5] sm:$0x7] }
  0xf2   :  { %1772 = vsinq.f32 %v192_v9  ;;  %v313_v9 = vld [vmem:[#allocation2 + $0x10] sm:$0xff] }
  0xfe   :  { %v2005_v14 = vpop.eup %1770 }
  0xff   :  { %v2007_v15 = vpop.eup %1772  ;;  %v203_v16 = vxor.u32 2147483648, %v2005_v14 }
 0x100   :  { %v200_v17 = vxor.u32 2147483648, %v2007_v15 }
 0x101   :  { %v308_v59 = vsel %vm306_vm10, %v203_v16, %v2007_v15  ;;  %v204_v6 = vsel %vm202_vm15, %v203_v16, %v2007_v15  ;;  %v746_v16 = vld [vmem:[#allocation6 + $0x78] sm:$0xff] }
 0x102   :  { %v305_v18 = vsel %vm303_vm11, %v2005_v14, %v200_v17  ;;  %v201_v5 = vsel %vm199_vm14, %v2005_v14, %v200_v17  ;;  %v701_v14 = vsub.s32 2, %v2053_v13  ;;  %v839_v17 = vld [vmem:[#allocation7 + $0x78] sm:$0xff] }
 0x103   :  { %v309_v19 = vsel %vm302_vm12, %v305_v18, %v308_v59  ;;  %v205_v10 = vsel %vm198_vm1, %v201_v5, %v204_v6  ;;  %v745_v59 = vld [vmem:[#allocation6 + $0x70] sm:$0xff] }
 0x104   :  { %v310_v22 = vsel %vm196_vm13, nan, %v309_v19  ;;  %v206_v11 = vsel %vm196_vm13, nan, %v205_v10  ;;  %v2062_v15 = vrot.slane %v2059_v54, %v701_v14  ;;  %v838_v18 = vld [vmem:[#allocation7 + $0x70] sm:$0xff]  ;;  %v744_v19 = vld [vmem:[#allocation6 + $0x68] sm:$0xff]  ;;  %v697_v14 = vsub.s32 1, %v2053_v13 }
 0x105   :  { %472 = vmatmul.mubr.f32.vlgmr.msra.gmra.mxu0 %v310_v22  ;;  %1501 = vmatmul.mubr.f32.vlgmr.msra.gmra.mxu1 %v310_v22  ;;  %v836_v22 = vld [vmem:[#allocation7 + $0x60] sm:$0xff] }
 0x106   :  { %549 = vmatpush1.msra.mxu0 %v356_v20  ;;  %1504 = vmatpush3.msra.mxu1 %v358_v21  ;;  %v837_v20 = vld [vmem:[#allocation7 + $0x68] sm:$0xff]  ;;  %v743_v21 = vld [vmem:[#allocation6 + $0x60] sm:$0xff] }
 0x107   :  { %550 = vmatprep.subr.mxu0 %v354_v23  ;;  %1505 = vmatprep.subr.mxu1 %v1881_v3  ;;  %v742_v23 = vld [vmem:[#allocation6 + $0x58] sm:$0xff] }
 0x108   :  { %551 = vmatpush1.msra.mxu0 %v353_v24  ;;  %1506 = vmatpush3.msra.mxu1 %v355_v25  ;;  %v835_v24 = vld [vmem:[#allocation7 + $0x58] sm:$0xff]  ;;  %v741_v25 = vld [vmem:[#allocation6 + $0x50] sm:$0xff] }
 0x109   :  { %552 = vmatprep.subr.mxu0 %v351_v26  ;;  %1507 = vmatprep.subr.mxu1 %v1881_v3  ;;  %v834_v26 = vld [vmem:[#allocation7 + $0x50] sm:$0xff] }
 0x10a   :  { %553 = vmatpush1.msra.mxu0 %v350_v27  ;;  %1508 = vmatpush3.msra.mxu1 %v352_v28  ;;  %v740_v27 = vld [vmem:[#allocation6 + $0x48] sm:$0xff] }
 0x10b   :  { %554 = vmatprep.subr.mxu0 %v348_v29  ;;  %1509 = vmatprep.subr.mxu1 %v1881_v3  ;;  %v833_v28 = vld [vmem:[#allocation7 + $0x48] sm:$0xff]  ;;  %v739_v29 = vld [vmem:[#allocation6 + $0x40] sm:$0xff] }
 0x10c   :  { %555 = vmatpush1.msra.mxu0 %v347_v30  ;;  %1510 = vmatpush3.msra.mxu1 %v349_v31  ;;  %v832_v30 = vld [vmem:[#allocation7 + $0x40] sm:$0xff]  ;;  %v738_v31 = vld [vmem:[#allocation6 + $0x38] sm:$0xff] }
 0x10d   :  { %556 = vmatprep.subr.mxu0 %v345_v32  ;;  %1511 = vmatprep.subr.mxu1 %v1881_v3  ;;  %v831_v32 = vld [vmem:[#allocation7 + $0x38] sm:$0xff] }
 0x10e   :  { %557 = vmatpush1.msra.mxu0 %v344_v33  ;;  %1512 = vmatpush3.msra.mxu1 %v346_v34  ;;  %v737_v33 = vld [vmem:[#allocation6 + $0x30] sm:$0xff] }
 0x10f   :  { %558 = vmatprep.subr.mxu0 %v342_v35  ;;  %1513 = vmatprep.subr.mxu1 %v1881_v3  ;;  %v830_v34 = vld [vmem:[#allocation7 + $0x30] sm:$0xff]  ;;  %v736_v35 = vld [vmem:[#allocation6 + $0x28] sm:$0xff] }
 0x110   :  { %559 = vmatpush1.msra.mxu0 %v341_v36  ;;  %1514 = vmatpush3.msra.mxu1 %v343_v37  ;;  %v829_v36 = vld [vmem:[#allocation7 + $0x28] sm:$0xff]  ;;  %v735_v37 = vld [vmem:[#allocation6 + $0x20] sm:$0xff] }
 0x111   :  { %560 = vmatprep.subr.mxu0 %v339_v38  ;;  %1515 = vmatprep.subr.mxu1 %v1881_v3  ;;  %v828_v38 = vld [vmem:[#allocation7 + $0x20] sm:$0xff] }
 0x112   :  { %561 = vmatpush1.msra.mxu0 %v338_v39  ;;  %1516 = vmatpush3.msra.mxu1 %v340_v40  ;;  %v734_v39 = vld [vmem:[#allocation6 + $0x18] sm:$0xff] }
 0x113   :  { %562 = vmatprep.subr.mxu0 %v336_v41  ;;  %1517 = vmatprep.subr.mxu1 %v1881_v3  ;;  %v827_v40 = vld [vmem:[#allocation7 + $0x18] sm:$0xff]  ;;  %v733_v41 = vld [vmem:[#allocation6 + $0x10] sm:$0xff] }
 0x114   :  { %563 = vmatpush1.msra.mxu0 %v335_v42  ;;  %1518 = vmatpush3.msra.mxu1 %v337_v43  ;;  %v826_v42 = vld [vmem:[#allocation7 + $0x10] sm:$0xff]  ;;  %v732_v43 = vld [vmem:[#allocation6 + $0x8] sm:$0xff] }
 0x115   :  { %564 = vmatprep.subr.mxu0 %v333_v44  ;;  %1519 = vmatprep.subr.mxu1 %v1881_v3  ;;  %v825_v44 = vld [vmem:[#allocation7 + $0x8] sm:$0xff] }
 0x116   :  { %565 = vmatpush1.msra.mxu0 %v332_v45  ;;  %1520 = vmatpush3.msra.mxu1 %v334_v46  ;;  %v731_v45 = vld [vmem:[#allocation6] sm:$0xff] }
 0x117   :  { %566 = vmatprep.subr.mxu0 %v330_v47  ;;  %1521 = vmatprep.subr.mxu1 %v1881_v3  ;;  %v730_v46 = vld [vmem:[%s2199_s0] sm:$0xff] }
 0x118   :  { %567 = vmatpush1.msra.mxu0 %v329_v48  ;;  %1522 = vmatpush3.msra.mxu1 %v331_v49  ;;  %v824_v47 = vld [vmem:[#allocation7] sm:$0xff] }
 0x119   :  { %568 = vmatprep.subr.mxu0 %v327_v50  ;;  %1523 = vmatprep.subr.mxu1 %v1881_v3  ;;  %v935_v50 = vld [vmem:[#allocation6 + $0xf8] sm:$0xff] }
 0x11a   :  { %569 = vmatpush1.msra.mxu0 %v326_v51  ;;  %1524 = vmatpush3.msra.mxu1 %v328_v52  ;;  %v934_v51 = vld [vmem:[#allocation6 + $0xf0] sm:$0xff]  ;;  %v933_v52 = vld [vmem:[#allocation6 + $0xe8] sm:$0xff] }
 0x11b   :  { %570 = vmatprep.subr.mxu0 %v324_v53  ;;  %1525 = vmatprep.subr.mxu1 %v1881_v3  ;;  %v932_v53 = vld [vmem:[#allocation6 + $0xe0] sm:$0xff] }
 0x11c   :  { %571 = vmatpush1.msra.mxu0 %v323_v55  ;;  %1526 = vmatpush3.msra.mxu1 %v325_v56  ;;  %v931_v55 = vld [vmem:[#allocation6 + $0xd8] sm:$0xff]  ;;  %v930_v56 = vld [vmem:[#allocation6 + $0xd0] sm:$0xff] }
 0x11d   :  { %572 = vmatprep.subr.mxu0 %v321_v57  ;;  %1527 = vmatprep.subr.mxu1 %v1881_v3  ;;  %v929_v57 = vld [vmem:[#allocation6 + $0xc8] sm:$0xff] }
 0x11e   :  { %573 = vmatpush1.msra.mxu0 %v320_v60  ;;  %1528 = vmatpush3.msra.mxu1 %v322_v61  ;;  %v927_v60 = vld [vmem:[#allocation6 + $0xb8] sm:$0xff]  ;;  %v926_v61 = vld [vmem:[#allocation6 + $0xb0] sm:$0xff] }
 0x11f   :  { %574 = vmatprep.subr.mxu0 %v318_v62  ;;  %1529 = vmatprep.subr.mxu1 %v1881_v3  ;;  %v925_v62 = vld [vmem:[#allocation6 + $0xa8] sm:$0xff] }
 0x120   :  { %575 = vmatpush1.msra.mxu0 %v317_v63  ;;  %1530 = vmatpush3.msra.mxu1 %v319_v0  ;;  %v693_v0 = vsub.s32 0, %v2053_v13  ;;  %v1028_v13 = vld [vmem:[#allocation7 + $0xe8] sm:$0xff] }
 0x121   :  { %576 = vmatprep.subr.mxu0 %v315_v1  ;;  %1531 = vmatprep.subr.mxu1 %v1881_v3  ;;  %v924_v1 = vld [vmem:[#allocation6 + $0xa0] sm:$0xff] }
 0x122   :  { %577 = vmatpush1.msra.mxu0 %v314_v2  ;;  %1532 = vmatpush3.msra.mxu1 %v316_v4  ;;  %v694_v4 = vrot.slane %v2059_v54, %v693_v0 }
 0x123   :  { %578 = vmatprep.subr.mxu0 %v312_v7  ;;  %1533 = vmatprep.subr.mxu1 %v1881_v3 }
 0x124   :  { %579 = vmatpush1.msra.mxu0 %v311_v8  ;;  %612 = vmatprep.mubr.f32.mxu0 %v1881_v3 }
 0x125   :  { %1534 = vmatpush3.msra.mxu1 %v313_v9  ;;  %1535 = vmatprep.mubr.msk.f32.mxu1 %vm1882_vm0, %v1881_v3 }
 0x126   :  { %613 = vmatmul.mubr.f32.vlgmr.msra.gmra.mxu0 %v206_v11  ;;  %1536 = vmatmul.mubr.f32.vlgmr.msra.gmra.mxu1 %v206_v11 }
 0x127   :  { %1538 = vmatprep.subr.mxu0 %v1881_v3  ;;  %1573 = vmatprep.subr.mxu1 %v1881_v3 }
 0x128   :  { %1570 = vmatprep.mubr.msk.f32.mxu0 %vm1882_vm0, %v1881_v3  ;;  %1605 = vmatprep.mubr.msk.f32.mxu1 %vm1882_vm0, %v1881_v3 }
 0x129   :  { %1539 = vmatpush3.msra.mxu0 %v746_v16  ;;  %1574 = vmatpush3.msra.mxu1 %v839_v17 }
 0x12a   :  { %1540 = vmatprep.subr.mxu0 %v1881_v3  ;;  %1575 = vmatprep.subr.mxu1 %v1881_v3 }
 0x12b   :  { %1541 = vmatpush3.msra.mxu0 %v745_v59  ;;  %1576 = vmatpush3.msra.mxu1 %v838_v18 }
 0x12c   :  { %1542 = vmatprep.subr.mxu0 %v1881_v3  ;;  %1577 = vmatprep.subr.mxu1 %v1881_v3 }
 0x12d   :  { %1543 = vmatpush3.msra.mxu0 %v744_v19  ;;  %1578 = vmatpush3.msra.mxu1 %v837_v20  ;;  %v698_v19 = vrot.slane %v2059_v54, %v697_v14  ;;  %v1027_v54 = vld [vmem:[#allocation7 + $0xe0] sm:$0xff] }
 0x12e   :  { %1544 = vmatprep.subr.mxu0 %v1881_v3  ;;  %1579 = vmatprep.subr.mxu1 %v1881_v3 }
 0x12f   :  { %1545 = vmatpush3.msra.mxu0 %v743_v21  ;;  %1580 = vmatpush3.msra.mxu1 %v836_v22 }
 0x130   :  { %1546 = vmatprep.subr.mxu0 %v1881_v3  ;;  %1581 = vmatprep.subr.mxu1 %v1881_v3 }
 0x131   :  { %1547 = vmatpush3.msra.mxu0 %v742_v23  ;;  %1582 = vmatpush3.msra.mxu1 %v835_v24  ;;  %v1030_v24 = vld [vmem:[#allocation7 + $0xf8] sm:$0xff] }
 0x132   :  { %1548 = vmatprep.subr.mxu0 %v1881_v3  ;;  %1583 = vmatprep.subr.mxu1 %v1881_v3 }
 0x133   :  { %1549 = vmatpush3.msra.mxu0 %v741_v25  ;;  %1584 = vmatpush3.msra.mxu1 %v834_v26  ;;  %v1026_v25 = vld [vmem:[#allocation7 + $0xd8] sm:$0xff] }
 0x134   :  { %1550 = vmatprep.subr.mxu0 %v1881_v3  ;;  %1585 = vmatprep.subr.mxu1 %v1881_v3 }
 0x135   :  { %1551 = vmatpush3.msra.mxu0 %v740_v27  ;;  %1586 = vmatpush3.msra.mxu1 %v833_v28  ;;  %v1025_v27 = vld [vmem:[#allocation7 + $0xd0] sm:$0xff] }
 0x136   :  { %1552 = vmatprep.subr.mxu0 %v1881_v3  ;;  %1587 = vmatprep.subr.mxu1 %v1881_v3 }
 0x137   :  { %1553 = vmatpush3.msra.mxu0 %v739_v29  ;;  %1588 = vmatpush3.msra.mxu1 %v832_v30  ;;  %v1024_v29 = vld [vmem:[#allocation7 + $0xc8] sm:$0xff]  ;;  %v1023_v30 = vld [vmem:[#allocation7 + $0xc0] sm:$0xff] }
 0x138   :  { %1554 = vmatprep.subr.mxu0 %v1881_v3  ;;  %1589 = vmatprep.subr.mxu1 %v1881_v3 }
 0x139   :  { %1555 = vmatpush3.msra.mxu0 %v738_v31  ;;  %1590 = vmatpush3.msra.mxu1 %v831_v32  ;;  %v1022_v31 = vld [vmem:[#allocation7 + $0xb8] sm:$0xff]  ;;  %v1021_v32 = vld [vmem:[#allocation7 + $0xb0] sm:$0xff] }
 0x13a   :  { %1556 = vmatprep.subr.mxu0 %v1881_v3  ;;  %1591 = vmatprep.subr.mxu1 %v1881_v3 }
 0x13b   :  { %1557 = vmatpush3.msra.mxu0 %v737_v33  ;;  %1592 = vmatpush3.msra.mxu1 %v830_v34  ;;  %v1020_v33 = vld [vmem:[#allocation7 + $0xa8] sm:$0xff]  ;;  %v1019_v34 = vld [vmem:[#allocation7 + $0xa0] sm:$0xff] }
 0x13c   :  { %1558 = vmatprep.subr.mxu0 %v1881_v3  ;;  %1593 = vmatprep.subr.mxu1 %v1881_v3 }
 0x13d   :  { %1559 = vmatpush3.msra.mxu0 %v736_v35  ;;  %1594 = vmatpush3.msra.mxu1 %v829_v36  ;;  %v1018_v36 = vld [vmem:[#allocation7 + $0x98] sm:$0xff] }
 0x13e   :  { %1560 = vmatprep.subr.mxu0 %v1881_v3  ;;  %1595 = vmatprep.subr.mxu1 %v1881_v3 }
 0x13f   :  { %1561 = vmatpush3.msra.mxu0 %v735_v37  ;;  %1596 = vmatpush3.msra.mxu1 %v828_v38  ;;  %v1017_v37 = vld [vmem:[#allocation7 + $0x90] sm:$0xff]  ;;  %v1016_v38 = vld [vmem:[#allocation7 + $0x88] sm:$0xff] }
 0x140   :  { %1562 = vmatprep.subr.mxu0 %v1881_v3  ;;  %1597 = vmatprep.subr.mxu1 %v1881_v3 }
 0x141   :  { %1563 = vmatpush3.msra.mxu0 %v734_v39  ;;  %1598 = vmatpush3.msra.mxu1 %v827_v40  ;;  %v1015_v40 = vld [vmem:[#allocation7 + $0x80] sm:$0xff] }
 0x142   :  { %1564 = vmatprep.subr.mxu0 %v1881_v3  ;;  %1599 = vmatprep.subr.mxu1 %v1881_v3 }
 0x143   :  { %1565 = vmatpush3.msra.mxu0 %v733_v41  ;;  %1600 = vmatpush3.msra.mxu1 %v826_v42  ;;  %v1222_v42 = vld [vmem:[#allocation7 + $0x178] sm:$0xff] }
 0x144   :  { %1566 = vmatprep.subr.mxu0 %v1881_v3  ;;  %1601 = vmatprep.subr.mxu1 %v1881_v3 }
 0x145   :  { %1567 = vmatpush3.msra.mxu0 %v732_v43  ;;  %1602 = vmatpush3.msra.mxu1 %v825_v44  ;;  %v1221_v43 = vld [vmem:[#allocation7 + $0x170] sm:$0xff]  ;;  %v1220_v44 = vld [vmem:[#allocation7 + $0x168] sm:$0xff] }
 0x146   :  { %1568 = vmatprep.subr.mxu0 %v1881_v3  ;;  %1603 = vmatprep.subr.mxu1 %v1881_v3 }
 0x147   :  { %1569 = vmatpush3.msra.mxu0 %v731_v45  ;;  %1604 = vmatpush3.msra.mxu1 %v824_v47  ;;  %v1219_v45 = vld [vmem:[#allocation7 + $0x160] sm:$0xff] }
 0x148   :  { %1571 = vmatmul.mubr.f32.vlgmr.msra.gmra.mxu0 %v730_v46  ;;  %1643 = vmatprep.subr.mxu1 %v1881_v3  ;;  %v1218_v46 = vld [vmem:[#allocation7 + $0x158] sm:$0xff] }
 0x149   :  { %1608 = vmatprep.subr.mxu0 %v1881_v3  ;;  %1640 = vmatprep.mubr.msk.f32.mxu0 %vm1882_vm0, %v1881_v3 }
 0x14a   :  { %1609 = vmatpush3.msra.mxu0 %v935_v50  ;;  %v1216_v50 = vld [vmem:[#allocation7 + $0x148] sm:$0xff] }
 0x14b   :  { %1610 = vmatprep.subr.mxu0 %v1881_v3 }
 0x14c   :  { %1611 = vmatpush3.msra.mxu0 %v934_v51  ;;  %v1215_v51 = vld [vmem:[#allocation7 + $0x140] sm:$0xff] }
 0x14d   :  { %1612 = vmatprep.subr.mxu0 %v1881_v3 }
 0x14e   :  { %1613 = vmatpush3.msra.mxu0 %v933_v52  ;;  %v1214_v52 = vld [vmem:[#allocation7 + $0x138] sm:$0xff] }
 0x14f   :  { %1614 = vmatprep.subr.mxu0 %v1881_v3 }
 0x150   :  { %1615 = vmatpush3.msra.mxu0 %v932_v53  ;;  %v1213_v53 = vld [vmem:[#allocation7 + $0x130] sm:$0xff] }
 0x151   :  { %1616 = vmatprep.subr.mxu0 %v1881_v3 }
 0x152   :  { %1617 = vmatpush3.msra.mxu0 %v931_v55  ;;  %v1212_v55 = vld [vmem:[#allocation7 + $0x128] sm:$0xff] }
 0x153   :  { %1618 = vmatprep.subr.mxu0 %v1881_v3 }
 0x154   :  { %1619 = vmatpush3.msra.mxu0 %v930_v56  ;;  %v1211_v56 = vld [vmem:[#allocation7 + $0x120] sm:$0xff] }
 0x155   :  { %1620 = vmatprep.subr.mxu0 %v1881_v3 }
 0x156   :  { %1621 = vmatpush3.msra.mxu0 %v929_v57  ;;  %v1210_v57 = vld [vmem:[#allocation7 + $0x118] sm:$0xff] }
 0x157   :  { %1622 = vmatprep.subr.mxu0 %v1881_v3 }
 0x158   :  { %1623 = vmatpush3.msra.mxu0 %v928_v58  ;;  %v1209_v58 = vld [vmem:[#allocation7 + $0x110] sm:$0xff] }
 0x159   :  { %1624 = vmatprep.subr.mxu0 %v1881_v3 }
 0x15a   :  { %1625 = vmatpush3.msra.mxu0 %v927_v60  ;;  %v1208_v60 = vld [vmem:[#allocation7 + $0x108] sm:$0xff] }
 0x15b   :  { %1626 = vmatprep.subr.mxu0 %v1881_v3 }
 0x15c   :  { %1627 = vmatpush3.msra.mxu0 %v926_v61 }
 0x15d   :  { %1628 = vmatprep.subr.mxu0 %v1881_v3 }
 0x15e   :  { %1629 = vmatpush3.msra.mxu0 %v925_v62  ;;  %v1207_v62 = vld [vmem:[#allocation7 + $0x100] sm:$0xff] }
 0x15f   :  { %1630 = vmatprep.subr.mxu0 %v1881_v3 }
 0x160   :  { %1631 = vmatpush3.msra.mxu0 %v924_v1  ;;  %v923_v1 = vld [vmem:[#allocation6 + $0x98] sm:$0xff] }
 0x161   :  { %1632 = vmatprep.subr.mxu0 %v1881_v3 }
 0x162   :  { %1633 = vmatpush3.msra.mxu0 %v923_v1 }
 0x163   :  { %1634 = vmatprep.subr.mxu0 %v1881_v3 }
 0x1c5   :  { %v544_v48 = vpop.f32.mrf.mxu1  ;;  %v473_v63 = vpop.f32.mrf.mxu0 }
 0x1c7   :  { %v1502_v49 = vpop.f32.mrf.mxu1  ;;  %v475_v2 = vpop.f32.mrf.mxu0 }
 0x1e6   :  { %v614_v5 = vpop.f32.mrf.mxu0  ;;  %v685_v6 = vpop.f32.mrf.mxu1 }
 0x1e7   :  { %v615_v7 = vadd.f32 %v614_v5, %v473_v63  ;;  %v686_v8 = vadd.f32 %v685_v6, %v544_v48  ;;  %v1217_v48 = vld [vmem:[#allocation7 + $0x150] sm:$0xff]  ;;  %v921_v5 = vld [vmem:[#allocation6 + $0x88] sm:$0xff]  ;;  %v920_v6 = vld [vmem:[#allocation6 + $0x80] sm:$0xff] }
 0x1e8   :  { %v1537_v9 = vpop.f32.mrf.mxu1  ;;  %v616_v16 = vpop.f32.mrf.mxu0 }
 0x1e9   :  { %v706_v10 = vadd.f32 %v694_v4, %v615_v7  ;;  %v2116_v11 = vadd.f32 %v2062_v15, %v686_v8  ;;  %v617_v18 = vadd.f32 %v616_v16, %v475_v2  ;;  %v1029_v15 = vld [vmem:[#allocation7 + $0xf0] sm:$0xff]  ;;  %v1322_v7 = vld [vmem:[%s2206_s7] ss:$0 sm:$0xff] }
 0x1ea   :  { %v922_v4 = vld [vmem:[#allocation6 + $0x90] sm:$0xff]  ;;  %v1323_v8 = vld [vmem:[%s2208_s9] ss:$0 sm:$0xff] }
 0x1eb   :  { %v1319_v12 = vmul.f32 -1.442695, %v706_v10  ;;  %v707_v20 = vadd.f32 %v698_v19, %v617_v18  ;;  %v1321_v35 = vmul.f32 -1.442695, %v2116_v11  ;;  %1635 = vmatpush3.msra.mxu0 %v922_v4  ;;  %v1125_v18 = vld [vmem:[#allocation6 + $0x168] sm:$0xff]  ;;  %v1124_v19 = vld [vmem:[#allocation6 + $0x160] sm:$0xff] }
 0x1ec   :  { %1636 = vmatprep.subr.mxu0 %v1881_v3 }
 0x1ed   :  { %1774 = vpow2.f32 %v1319_v12  ;;  %v1320_v21 = vmul.f32 -1.442695, %v707_v20  ;;  %1637 = vmatpush3.msra.mxu0 %v921_v5 }
 0x1ee   :  { %1638 = vmatprep.subr.mxu0 %v1881_v3 }
 0x1ef   :  { %1639 = vmatpush3.msra.mxu0 %v920_v6 }
 0x1f0   :  { %1678 = vmatprep.subr.mxu0 %v1881_v3 }
 0x1fa   :  { %v1775_v17 = vpop.eup %1774 }
 0x1fb   :  { %v718_v59 = vadd.f32 1.0, %v1775_v17  ;;  %v1127_v17 = vld [vmem:[#allocation6 + $0x178] sm:$0xff] }
 0x1fd   :  { %1776 = vrcp.f32 %v718_v59  ;;  %v1126_v59 = vld [vmem:[#allocation6 + $0x170] sm:$0xff] }
 0x1fe   :  { %1778 = vpow2.f32 %v1320_v21  ;;  %v1122_v21 = vld [vmem:[#allocation6 + $0x150] sm:$0xff] }
 0x208   :  { %v820_v0 = vpop.f32.mrf.mxu0 }
 0x209   :  { %v821_v9 = vadd.f32 %v1322_v7, %v820_v0 }
 0x20a   :  { %v1777_v22 = vpop.eup %1776  ;;  %v1572_v2 = vpop.f32.mrf.mxu0 }
 0x20b   :  { %v727_v23 = vmul.f32 %v1777_v22, %v706_v10  ;;  %v1779_v26 = vpop.eup %1778  ;;  %v1121_v22 = vld [vmem:[#allocation6 + $0x148] sm:$0xff] }
 0x20c   :  { %v719_v28 = vadd.f32 1.0, %v1779_v26 }
 0x20d   :  { %1606 = vmatmul.mubr.f32.vlgmr.msra.gmra.mxu1 %v727_v23  ;;  %v1120_v23 = vld [vmem:[#allocation6 + $0x140] sm:$0xff] }
 0x20e   :  { %1644 = vmatpush3.msra.mxu1 %v1030_v24  ;;  %1675 = vmatprep.mubr.msk.f32.mxu1 %vm1882_vm0, %v1881_v3  ;;  %1780 = vrcp.f32 %v719_v28  ;;  %v1119_v24 = vld [vmem:[#allocation6 + $0x138] sm:$0xff] }
 0x20f   :  { %1645 = vmatprep.subr.mxu1 %v1881_v3  ;;  %1782 = vpow2.f32 %v1321_v35 }
 0x210   :  { %1646 = vmatpush3.msra.mxu1 %v1029_v15  ;;  %v1118_v15 = vld [vmem:[#allocation6 + $0x130] sm:$0xff] }
 0x211   :  { %1647 = vmatprep.subr.mxu1 %v1881_v3 }
 0x212   :  { %1648 = vmatpush3.msra.mxu1 %v1028_v13  ;;  %v1117_v13 = vld [vmem:[#allocation6 + $0x128] sm:$0xff] }
 0x213   :  { %1649 = vmatprep.subr.mxu1 %v1881_v3 }
 0x214   :  { %1650 = vmatpush3.msra.mxu1 %v1027_v54  ;;  %v1116_v54 = vld [vmem:[#allocation6 + $0x120] sm:$0xff] }
 0x215   :  { %1651 = vmatprep.subr.mxu1 %v1881_v3 }
 0x216   :  { %1652 = vmatpush3.msra.mxu1 %v1026_v25 }
 0x217   :  { %1653 = vmatprep.subr.mxu1 %v1881_v3 }
 0x218   :  { %1654 = vmatpush3.msra.mxu1 %v1025_v27 }
 0x219   :  { %1655 = vmatprep.subr.mxu1 %v1881_v3 }
 0x21a   :  { %1656 = vmatpush3.msra.mxu1 %v1024_v29  ;;  %v1115_v29 = vld [vmem:[#allocation6 + $0x118] sm:$0xff] }
 0x21b   :  { %1657 = vmatprep.subr.mxu1 %v1881_v3  ;;  %v1781_v39 = vpop.eup %1780 }
 0x21c   :  { %1658 = vmatpush3.msra.mxu1 %v1023_v30  ;;  %v728_v41 = vmul.f32 %v1781_v39, %v707_v20  ;;  %v1783_v47 = vpop.eup %1782  ;;  %v1123_v20 = vld [vmem:[#allocation6 + $0x158] sm:$0xff]  ;;  %v1114_v30 = vld [vmem:[#allocation6 + $0x110] sm:$0xff] }
 0x21d   :  { %1659 = vmatprep.subr.mxu1 %v1881_v3  ;;  %v720_v49 = vadd.f32 1.0, %v1783_v47 }
 0x21e   :  { %1660 = vmatpush3.msra.mxu1 %v1022_v31  ;;  %v1113_v31 = vld [vmem:[#allocation6 + $0x108] sm:$0xff] }
 0x21f   :  { %1661 = vmatprep.subr.mxu1 %v1881_v3  ;;  %1784 = vrcp.f32 %v720_v49 }
 0x220   :  { %1662 = vmatpush3.msra.mxu1 %v1021_v32  ;;  %v1112_v32 = vld [vmem:[#allocation6 + $0x100] sm:$0xff] }
 0x221   :  { %1663 = vmatprep.subr.mxu1 %v1881_v3 }
 0x222   :  { %1664 = vmatpush3.msra.mxu1 %v1020_v33  ;;  %v1327_v33 = vld [vmem:[%s2208_s9 + $0x1] ss:$0 sm:$0xff] }
 0x223   :  { %1665 = vmatprep.subr.mxu1 %v1881_v3 }
 0x224   :  { %1666 = vmatpush3.msra.mxu1 %v1019_v34  ;;  %v1325_v34 = vld [vmem:[%s2206_s7 + $0x1] ss:$0 sm:$0xff] }
 0x225   :  { %1667 = vmatprep.subr.mxu1 %v1881_v3 }
 0x226   :  { %1668 = vmatpush3.msra.mxu1 %v1018_v36 }
 0x227   :  { %1669 = vmatprep.subr.mxu1 %v1881_v3 }
 0x228   :  { %1670 = vmatpush3.msra.mxu1 %v1017_v37 }
 0x229   :  { %1671 = vmatprep.subr.mxu1 %v1881_v3 }
 0x22a   :  { %1672 = vmatpush3.msra.mxu1 %v1016_v38 }
 0x22b   :  { %1673 = vmatprep.subr.mxu1 %v1881_v3 }
 0x22c   :  { %1674 = vmatpush3.msra.mxu1 %v1015_v40  ;;  %v1785_v61 = vpop.eup %1784 }
 0x22d   :  { %1676 = vmatmul.mubr.f32.vlgmr.msra.gmra.mxu1 %v728_v41  ;;  %1713 = vmatprep.subr.mxu1 %v1881_v3  ;;  %v729_v63 = vmul.f32 %v1785_v61, %v2116_v11  ;;  %v1329_v41 = vld [vmem:[%s2206_s7 + $0x2] ss:$0 sm:$0xff] }
 0x22e   :  { %1714 = vmatpush3.msra.mxu1 %v1222_v42  ;;  %1745 = vmatprep.mubr.msk.f32.mxu1 %vm1882_vm0, %v1881_v3 }
 0x22f   :  { %1715 = vmatprep.subr.mxu1 %v1881_v3 }
 0x230   :  { %1716 = vmatpush3.msra.mxu1 %v1221_v43 }
 0x231   :  { %1717 = vmatprep.subr.mxu1 %v1881_v3 }
 0x232   :  { %1718 = vmatpush3.msra.mxu1 %v1220_v44 }
 0x233   :  { %1719 = vmatprep.subr.mxu1 %v1881_v3 }
 0x234   :  { %1720 = vmatpush3.msra.mxu1 %v1219_v45 }
 0x235   :  { %1721 = vmatprep.subr.mxu1 %v1881_v3 }
 0x236   :  { %1722 = vmatpush3.msra.mxu1 %v1218_v46 }
 0x237   :  { %1723 = vmatprep.subr.mxu1 %v1881_v3 }
 0x238   :  { %1724 = vmatpush3.msra.mxu1 %v1217_v48 }
 0x239   :  { %1725 = vmatprep.subr.mxu1 %v1881_v3 }
 0x23a   :  { %1726 = vmatpush3.msra.mxu1 %v1216_v50 }
 0x23b   :  { %1727 = vmatprep.subr.mxu1 %v1881_v3 }
 0x23c   :  { %1728 = vmatpush3.msra.mxu1 %v1215_v51 }
 0x23d   :  { %1729 = vmatprep.subr.mxu1 %v1881_v3 }
 0x23e   :  { %1730 = vmatpush3.msra.mxu1 %v1214_v52 }
 0x23f   :  { %1731 = vmatprep.subr.mxu1 %v1881_v3 }
 0x240   :  { %1732 = vmatpush3.msra.mxu1 %v1213_v53 }
 0x241   :  { %1733 = vmatprep.subr.mxu1 %v1881_v3 }
 0x242   :  { %1734 = vmatpush3.msra.mxu1 %v1212_v55 }
 0x243   :  { %1735 = vmatprep.subr.mxu1 %v1881_v3 }
 0x244   :  { %1736 = vmatpush3.msra.mxu1 %v1211_v56 }
 0x245   :  { %1737 = vmatprep.subr.mxu1 %v1881_v3 }
 0x246   :  { %1738 = vmatpush3.msra.mxu1 %v1210_v57 }
 0x247   :  { %1739 = vmatprep.subr.mxu1 %v1881_v3 }
 0x248   :  { %1740 = vmatpush3.msra.mxu1 %v1209_v58 }
 0x249   :  { %1741 = vmatprep.subr.mxu1 %v1881_v3 }
 0x24a   :  { %1742 = vmatpush3.msra.mxu1 %v1208_v60 }
 0x24b   :  { %1743 = vmatprep.subr.mxu1 %v1881_v3 }
 0x24c   :  { %1744 = vmatpush3.msra.mxu1 %v1207_v62 }
 0x24d   :  { %1746 = vmatmul.mubr.f32.vlgmr.msra.gmra.mxu1 %v729_v63 }
 0x2cd   :  { %v913_v10 = vpop.f32.mrf.mxu1 }
 0x2ce   :  { %v914_v11 = vadd.f32 %v1323_v8, %v913_v10 }
 0x2cf   :  { %v1607_v12 = vpop.f32.mrf.mxu1 }
 0x2d0   :  { %v917_v14 = vmul.f32 %v914_v11, %v821_v9 }
 0x2d2   :  { %v918_v16 = vmax.f32 %v917_v14, 0.0 }
 0x2d4   :  { %1641 = vmatmul.mubr.f32.vlgmr.msra.gmra.mxu0 %v918_v16 }
 0x2d5   :  { %1679 = vmatpush3.msra.mxu0 %v1127_v17  ;;  %1710 = vmatprep.mubr.msk.f32.mxu0 %vm1882_vm0, %v1881_v3 }
 0x2d6   :  { %1680 = vmatprep.subr.mxu0 %v1881_v3 }
 0x2d7   :  { %1681 = vmatpush3.msra.mxu0 %v1126_v59 }
 0x2d8   :  { %1682 = vmatprep.subr.mxu0 %v1881_v3 }
 0x2d9   :  { %1683 = vmatpush3.msra.mxu0 %v1125_v18 }
 0x2da   :  { %1684 = vmatprep.subr.mxu0 %v1881_v3 }
 0x2db   :  { %1685 = vmatpush3.msra.mxu0 %v1124_v19 }
 0x2dc   :  { %1686 = vmatprep.subr.mxu0 %v1881_v3 }
 0x2dd   :  { %1687 = vmatpush3.msra.mxu0 %v1123_v20 }
 0x2de   :  { %1688 = vmatprep.subr.mxu0 %v1881_v3 }
 0x2df   :  { %1689 = vmatpush3.msra.mxu0 %v1122_v21 }
 0x2e0   :  { %1690 = vmatprep.subr.mxu0 %v1881_v3 }
 0x2e1   :  { %1691 = vmatpush3.msra.mxu0 %v1121_v22 }
 0x2e2   :  { %1692 = vmatprep.subr.mxu0 %v1881_v3 }
 0x2e3   :  { %1693 = vmatpush3.msra.mxu0 %v1120_v23 }
 0x2e4   :  { %1694 = vmatprep.subr.mxu0 %v1881_v3 }
 0x2e5   :  { %1695 = vmatpush3.msra.mxu0 %v1119_v24 }
 0x2e6   :  { %1696 = vmatprep.subr.mxu0 %v1881_v3 }
 0x2e7   :  { %1697 = vmatpush3.msra.mxu0 %v1118_v15 }
 0x2e8   :  { %1698 = vmatprep.subr.mxu0 %v1881_v3 }
 0x2e9   :  { %1699 = vmatpush3.msra.mxu0 %v1117_v13 }
 0x2ea   :  { %1700 = vmatprep.subr.mxu0 %v1881_v3 }
 0x2eb   :  { %1701 = vmatpush3.msra.mxu0 %v1116_v54 }
 0x2ec   :  { %1702 = vmatprep.subr.mxu0 %v1881_v3 }
 0x2ed   :  { %v1105_v25 = vpop.f32.mrf.mxu1  ;;  %1703 = vmatpush3.msra.mxu0 %v1115_v29 }
 0x2ee   :  { %1704 = vmatprep.subr.mxu0 %v1881_v3  ;;  %v1106_v36 = vadd.f32 %v1327_v33, %v1105_v25 }
 0x2ef   :  { %v1677_v26 = vpop.f32.mrf.mxu1  ;;  %1705 = vmatpush3.msra.mxu0 %v1114_v30 }
 0x2f0   :  { %1706 = vmatprep.subr.mxu0 %v1881_v3 }
 0x2f1   :  { %1707 = vmatpush3.msra.mxu0 %v1113_v31 }
 0x2f2   :  { %1708 = vmatprep.subr.mxu0 %v1881_v3  ;;  %v1331_v3 = vld [vmem:[%s2208_s9 + $0x2] ss:$0 sm:$0xff] }
 0x2f3   :  { %1709 = vmatpush3.msra.mxu0 %v1112_v32 }
 0x30d   :  { %v1297_v27 = vpop.f32.mrf.mxu1 }
 0x30e   :  { %v1298_v43 = vadd.f32 %v1331_v3, %v1297_v27 }
 0x30f   :  { %v1747_v28 = vpop.f32.mrf.mxu1 }
 0x394   :  { %v1010_v35 = vpop.f32.mrf.mxu0 }
 0x395   :  { %v1011_v37 = vadd.f32 %v1325_v34, %v1010_v35 }
 0x396   :  { %v1642_v38 = vpop.f32.mrf.mxu0 }
 0x397   :  { %v1109_v39 = vmul.f32 %v1106_v36, %v1011_v37 }
 0x399   :  { %v1110_v40 = vmax.f32 %v1109_v39, 0.0 }
 0x39b   :  { %1711 = vmatmul.mubr.f32.vlgmr.msra.gmra.mxu0 %v1110_v40 }
 0x45b   :  { %v1202_v42 = vpop.f32.mrf.mxu0 }
 0x45c   :  { %v1203_v44 = vadd.f32 %v1329_v41, %v1202_v42 }
 0x45d   :  { %v1712_v45 = vpop.f32.mrf.mxu0 }
 0x45e   :  { %v1301_v46 = vmul.f32 %v1298_v43, %v1203_v44 }
 0x460   :  { %1302 = vst [vmem:[%s2209_s10] sm:$0xff] %v1301_v46 }
 0x461   :  { %1307 = vsyncpa [#allocation3], 1 }
 0x462   :  { %1308 = vsyncpa [#allocation5], 1 }
 0x463   :  { %1309 = vsyncpa [#allocation8], 1 }

</bundles_post_ra>
